<compile_context>
chip_gen: v5e
topology: v5e:2x2
jax: 0.10.0
libtpu: 0.0.40
codegen_flags: <defaults>
</compile_context>

<pallas_src>
import jax
import jax.numpy as jnp
from jax.experimental import pallas as pl
from jax.experimental.pallas import tpu as pltpu


def _round_up(x, m):
    return ((x + m - 1) // m) * m


def _make_gru_kernel(Hp, Tc, T_total, unroll):
    """Recurrent kernel over one time chunk of Tc steps (Hp = padded hidden)."""
    need_mask = (T_total % Tc) != 0

    def kernel(g_ref, wh_ref, bhn_ref, out_ref, h_scr):
        c = pl.program_id(1)                      # time-chunk index (serial)
        last = pl.num_programs(1) - 1

        @pl.when(c == 0)
        def _init():
            # PyTorch default h0 = 0; re-zeroed at c==0 for every batch block.
            h_scr[...] = jnp.zeros_like(h_scr)

        wh = wh_ref[...]                          # (Hp, 3*Hp) fused hidden weights (resident)
        # Hoisted once per chunk (JAX does not CSE broadcast_in_dim in the
        # unrolled loop); b_hn must stay inside the r-gated term.
        bhn = jnp.broadcast_to(bhn_ref[...], h_scr.shape)   # (Bb, Hp)
        t0 = c * Tc

        def make_step(masked):
            def step(s, h):
                # Precomputed x-gates (bf16 storage): x@Wi_cat + merged biases.
                g = g_ref[s].astype(jnp.float32)                  # (Bb, 3*Hp)
                # Single fused hidden matmul per step (one MXU push).
                hh = jnp.dot(h.astype(wh.dtype), wh,
                             preferred_element_type=jnp.float32)  # (Bb, 3*Hp)
                # Fused sigmoid over r|z lanes; slice at 128-aligned boundary.
                rz = jax.nn.sigmoid(g[:, :2 * Hp] + hh[:, :2 * Hp])
                r = rz[:, :Hp]
                z = rz[:, Hp:]
                n = jnp.tanh(g[:, 2 * Hp:] + r * (hh[:, 2 * Hp:] + bhn))
                h_new = (1.0 - z) * n + z * h
                if masked:
                    # Ignore time-padding steps (only possible in last chunk).
                    h_new = jnp.where(t0 + s < T_total, h_new, h)
                return h_new
            return step

        def run(masked):
            h_scr[...] = jax.lax.fori_loop(0, Tc, make_step(masked),
                                           h_scr[...], unroll=unroll)

        if need_mask:
            @pl.when(c == last)
            def _(): run(True)

            @pl.when(c != last)
            def _(): run(False)
        else:
            run(False)

        @pl.when(c == last)
        def _finalize():
            out_ref[...] = h_scr[...].astype(out_ref.dtype)

    return kernel


def gru_encoder(x_btd, params, *, time_chunk=32, batch_block=None,
                hp_align=128, mxu_dtype=jnp.float32,
                gate_store_dtype=jnp.bfloat16, unroll=8):
    """x_btd: (B, T, D_in) batch_first, like the PyTorch module. Returns (B, H).

    mxu_dtype:        dtype of the MXU operands (Wi_cat / x / Wh_cat / h).
                      jnp.bfloat16 is the preferred setting on real v6e/v7x
                      hardware; f32 default keeps the demo runnable everywhere.
    gate_store_dtype: storage dtype of the precomputed gate tensor (the
                      dominant HBM stream of the recurrent kernel).
    """
    B, T, D = x_btd.shape
    H = params["w_hr"].shape[0]
    f32 = jnp.float32

    Bp = _round_up(B, 8)                       # sublane multiple
    Bb = Bp if batch_block is None else _round_up(min(batch_block, Bp), 8)
    Bp = _round_up(Bp, Bb)                     # batch block must divide Bp
    Hp = _round_up(H, hp_align)                # lane multiple (256 for big-H v6e/v7x)
    Tc = max(1, min(time_chunk, T))
    num_chunks = pl.cdiv(T, Tc)
    T_pad = num_chunks * Tc
    unroll = max(1, min(unroll, Tc))

    def pad2(a, rows, cols):
        return jnp.pad(a.astype(f32), ((0, rows - a.shape[0]), (0, cols - a.shape[1])))

    def pad1(a, n):
        return jnp.pad(a.astype(f32), (0, n - a.shape[0]))

    # ---- hoisted input projection: one (Bp*T_pad, D) x (D, 3*Hp) matmul in XLA ----
    wi_cat = jnp.concatenate(
        [pad2(params["w_ir"].T, D, Hp),
         pad2(params["w_iz"].T, D, Hp),
         pad2(params["w_in"].T, D, Hp)], axis=1)                      # (D, 3*Hp)
    # b_ir+b_hr and b_iz+b_hz merge legally; b_in folds in here; b_hn must stay
    # inside the r-gated term, so it is passed to the kernel separately.
    b_fused = jnp.concatenate(
        [pad1(params["b_ir"] + params["b_hr"], Hp),
         pad1(params["b_iz"] + params["b_hz"], Hp),
         pad1(params["b_in"], Hp)])                                   # (3*Hp,)

    # Pad x *before* the einsum so the gate tensor comes out already padded
    # (no extra full read+write of the gate tensor for a post-hoc pad).
    # Padded batch rows never interact with real rows; padded time steps are
    # masked off in the last chunk; padded hidden lanes stay exactly 0.
    x_p = jnp.pad(x_btd.astype(mxu_dtype),
                  ((0, Bp - B), (0, T_pad - T), (0, 0)))              # (Bp, T_pad, D)
    gates = (jnp.einsum("btd,dg->tbg", x_p, wi_cat.astype(mxu_dtype),
                        preferred_element_type=f32)
             + b_fused).astype(gate_store_dtype)                      # (T_pad, Bp, 3*Hp)

    # ---- fused hidden weights: single lane-dense (Hp, 3*Hp) operand ----
    wh_cat = jnp.concatenate(
        [pad2(params["w_hr"].T, Hp, Hp),
         pad2(params["w_hz"].T, Hp, Hp),
         pad2(params["w_hn"].T, Hp, Hp)], axis=1).astype(mxu_dtype)   # (Hp, 3*Hp)
    b_hn = pad1(params["b_hn"], Hp)[None, :]                          # (1, Hp)

    kernel = _make_gru_kernel(Hp, Tc, T, unroll)

    out = pl.pallas_call(
        kernel,
        out_shape=jax.ShapeDtypeStruct((Bp, Hp), f32),
        grid_spec=pltpu.PrefetchScalarGridSpec(
            num_scalar_prefetch=0,
            grid=(Bp // Bb, num_chunks),          # (batch blocks, time chunks)
            in_specs=[
                pl.BlockSpec((Tc, Bb, 3 * Hp), lambda b, c: (c, b, 0)),  # gate chunk
                pl.BlockSpec((Hp, 3 * Hp), lambda b, c: (0, 0)),         # Wh_cat (resident)
                pl.BlockSpec((1, Hp), lambda b, c: (0, 0)),              # b_hn (resident)
            ],
            out_specs=pl.BlockSpec((Bb, Hp), lambda b, c: (b, 0)),       # resident per batch block
            scratch_shapes=[pltpu.VMEM((Bb, Hp), jnp.float32)],          # hidden-state carry
        ),
        compiler_params=pltpu.CompilerParams(
            # batch blocks are independent (v7x megacore); time recurrence is serial
            dimension_semantics=("parallel", "arbitrary")),
    )(gates, wh_cat, b_hn)

    return out[:B, :H]


def init_gru_params(key, input_size, hidden_size):
    """Deterministic init matching PyTorch GRU param shapes (uniform +-1/sqrt(H))."""
    k = 1.0 / jnp.sqrt(hidden_size)
    names_shapes = [
        ("w_ir", (hidden_size, input_size)), ("w_iz", (hidden_size, input_size)),
        ("w_in", (hidden_size, input_size)),
        ("w_hr", (hidden_size, hidden_size)), ("w_hz", (hidden_size, hidden_size)),
        ("w_hn", (hidden_size, hidden_size)),
        ("b_ir", (hidden_size,)), ("b_iz", (hidden_size,)), ("b_in", (hidden_size,)),
        ("b_hr", (hidden_size,)), ("b_hz", (hidden_size,)), ("b_hn", (hidden_size,)),
    ]
    keys = jax.random.split(key, len(names_shapes))
    return {name: jax.random.uniform(kk, shape, jnp.float32, -k, k)
            for (name, shape), kk in zip(names_shapes, keys)}


def gru_encoder_ref(x_btd, params):
    """Pure-JAX reference (lax.scan) for correctness checking."""
    B, T, D = x_btd.shape
    H = params["w_hr"].shape[0]
    h0 = jnp.zeros((B, H), jnp.float32)

    def step(h, x_t):
        i_r = x_t @ params["w_ir"].T + params["b_ir"]
        i_z = x_t @ params["w_iz"].T + params["b_iz"]
        i_n = x_t @ params["w_in"].T + params["b_in"]
        h_r = h @ params["w_hr"].T + params["b_hr"]
        h_z = h @ params["w_hz"].T + params["b_hz"]
        h_n = h @ params["w_hn"].T + params["b_hn"]
        r = jax.nn.sigmoid(i_r + h_r)
        z = jax.nn.sigmoid(i_z + h_z)
        n = jnp.tanh(i_n + r * h_n)
        h_new = (1.0 - z) * n + z * h
        return h_new, None

    h_last, _ = jax.lax.scan(step, h0, jnp.transpose(x_btd, (1, 0, 2)))
    return h_last


if __name__ == "__main__":
    B, T, D_IN, H = 4, 8, 16, 32

    key = jax.random.PRNGKey(0)
    k_x, k_p = jax.random.split(key)
    x = jax.random.normal(k_x, (B, T, D_IN), jnp.float32)
    params = init_gru_params(k_p, D_IN, H)

    z_ref = gru_encoder_ref(x, params)

    # Full-f32 path: tight check against the pure-JAX reference.
    z_f32 = gru_encoder(x, params, gate_store_dtype=jnp.float32)
    jax.block_until_ready(z_f32)
    assert z_f32.shape == (B, H)
    assert jnp.allclose(z_f32, z_ref, atol=1e-4, rtol=1e-4), \
        f"f32 max abs err = {jnp.max(jnp.abs(z_f32 - z_ref))}"

    # Default path: f32 MXU operands, bf16-stored gate tensor (halved HBM stream).
    z = gru_encoder(x, params)
    jax.block_until_ready(z)
    assert z.shape == (B, H)
    assert jnp.allclose(z, z_ref, atol=2e-2, rtol=2e-2), \
        f"bf16-gates max abs err = {jnp.max(jnp.abs(z - z_ref))}"

    print("KERNEL_OK")
</pallas_src>

<mosaic_0001>
module attributes {stable_mosaic.version = 11 : i64} {
  func.func @kernel(%arg0: i32, %arg1: i32, %arg2: memref<8x8x384xf32, #tpu.memory_space<vmem>>, %arg3: memref<128x384xf32, #tpu.memory_space<vmem>>, %arg4: memref<1x128xf32, #tpu.memory_space<vmem>>, %arg5: memref<8x128xf32, #tpu.memory_space<vmem>>, %arg6: memref<8x128xf32, #tpu.memory_space<vmem>>) attributes {dimension_semantics = [#tpu.dimension_semantics<parallel>, #tpu.dimension_semantics<arbitrary>], iteration_bounds = array<i64: 1, 1>, scalar_prefetch = 0 : i64, scratch_operands = 1 : i64, tpu.core_type = #tpu.core_type<tc>, window_params = [{transform_indices = @transform_0, window_bounds = array<i64: 8, 8, 384>}, {pipeline_mode = #tpu.pipeline_mode<synchronous>, transform_indices = @transform_1, window_bounds = array<i64: 128, 384>}, {pipeline_mode = #tpu.pipeline_mode<synchronous>, transform_indices = @transform_2, window_bounds = array<i64: 1, 128>}, {transform_indices = @transform_3, window_bounds = array<i64: 8, 128>}]} {
    %c0_i32 = arith.constant 0 : i32
    %0 = arith.cmpi eq, %arg1, %c0_i32 : i32
    %1 = arith.extui %0 : i1 to i32
    %c0_i32_0 = arith.constant 0 : i32
    %2 = arith.cmpi ne, %1, %c0_i32_0 : i32
    scf.if %2 {
      %cst_50 = arith.constant 0.000000e+00 : f32
      %212 = vector.broadcast %cst_50 : f32 to vector<8x128xf32>
      %c0_51 = arith.constant 0 : index
      %c0_52 = arith.constant 0 : index
      %213 = vector.load %arg6[%c0_51, %c0_52] : memref<8x128xf32, #tpu.memory_space<vmem>>, vector<8x128xf32>
      tpu.vector_store %arg6[%c0_51, %c0_52], %212 {strides = array<i32>} : memref<8x128xf32, #tpu.memory_space<vmem>>, vector<8x128xf32>,
    } else {
    }
    %c0 = arith.constant 0 : index
    %c0_1 = arith.constant 0 : index
    %3 = vector.load %arg3[%c0, %c0_1] : memref<128x384xf32, #tpu.memory_space<vmem>>, vector<128x384xf32>
    %c0_2 = arith.constant 0 : index
    %c0_3 = arith.constant 0 : index
    %4 = vector.load %arg4[%c0_2, %c0_3] : memref<1x128xf32, #tpu.memory_space<vmem>>, vector<1x128xf32>
    %5 = vector.shape_cast %4 : vector<1x128xf32> to vector<1x128xf32>
    %6 = vector.broadcast %5 : vector<1x128xf32> to vector<8x128xf32>
    %c0_4 = arith.constant 0 : index
    %c0_5 = arith.constant 0 : index
    %7 = vector.load %arg6[%c0_4, %c0_5] : memref<8x128xf32, #tpu.memory_space<vmem>>, vector<8x128xf32>
    %c0_i32_6 = arith.constant 0 : i32
    %8 = arith.index_cast %c0_i32_6 : i32 to index
    %c0_7 = arith.constant 0 : index
    %c0_8 = arith.constant 0 : index
    %9 = vector.load %arg2[%8, %c0_7, %c0_8] : memref<8x8x384xf32, #tpu.memory_space<vmem>>, vector<1x8x384xf32>
    %10 = vector.shape_cast %9 : vector<1x8x384xf32> to vector<8x384xf32>
    %cst = arith.constant dense<0.000000e+00> : vector<8x384xf32>
    %11 = tpu.matmul %7, %3, %cst {dimension_numbers = #tpu.dot_dimension_numbers<[1], [0], [0], [1], [0, 0, 1, 1], [], []>} : vector<8x128xf32>, vector<128x384xf32>, vector<8x384xf32> -> vector<8x384xf32>
    %12 = vector.extract_strided_slice %10 {offsets = [0, 0], sizes = [8, 256], strides = [1, 1]} : vector<8x384xf32> to vector<8x256xf32>
    %13 = vector.extract_strided_slice %11 {offsets = [0, 0], sizes = [8, 256], strides = [1, 1]} : vector<8x384xf32> to vector<8x256xf32>
    %14 = arith.addf %12, %13 : vector<8x256xf32>
    %15 = arith.negf %14 : vector<8x256xf32>
    %16 = math.exp %15 : vector<8x256xf32>
    %cst_9 = arith.constant 1.000000e+00 : f32
    %17 = vector.broadcast %cst_9 : f32 to vector<8x256xf32>
    %18 = arith.addf %17, %16 : vector<8x256xf32>
    %19 = arith.divf %17, %18 : vector<8x256xf32>
    %20 = vector.extract_strided_slice %19 {offsets = [0, 0], sizes = [8, 128], strides = [1, 1]} : vector<8x256xf32> to vector<8x128xf32>
    %21 = vector.extract_strided_slice %19 {offsets = [0, 128], sizes = [8, 128], strides = [1, 1]} : vector<8x256xf32> to vector<8x128xf32>
    %22 = vector.extract_strided_slice %10 {offsets = [0, 256], sizes = [8, 128], strides = [1, 1]} : vector<8x384xf32> to vector<8x128xf32>
    %23 = vector.extract_strided_slice %11 {offsets = [0, 256], sizes = [8, 128], strides = [1, 1]} : vector<8x384xf32> to vector<8x128xf32>
    %24 = arith.addf %23, %6 : vector<8x128xf32>
    %25 = arith.mulf %20, %24 : vector<8x128xf32>
    %26 = arith.addf %22, %25 : vector<8x128xf32>
    %27 = math.tanh %26 : vector<8x128xf32>
    %cst_10 = arith.constant 1.000000e+00 : f32
    %28 = vector.broadcast %cst_10 : f32 to vector<8x128xf32>
    %29 = arith.subf %28, %21 : vector<8x128xf32>
    %30 = arith.mulf %29, %27 : vector<8x128xf32>
    %31 = arith.mulf %21, %7 : vector<8x128xf32>
    %32 = arith.addf %30, %31 : vector<8x128xf32>
    %c1_i32 = arith.constant 1 : i32
    %33 = arith.index_cast %c1_i32 : i32 to index
    %c0_11 = arith.constant 0 : index
    %c0_12 = arith.constant 0 : index
    %34 = vector.load %arg2[%33, %c0_11, %c0_12] : memref<8x8x384xf32, #tpu.memory_space<vmem>>, vector<1x8x384xf32>
    %35 = vector.shape_cast %34 : vector<1x8x384xf32> to vector<8x384xf32>
    %cst_13 = arith.constant dense<0.000000e+00> : vector<8x384xf32>
    %36 = tpu.matmul %32, %3, %cst_13 {dimension_numbers = #tpu.dot_dimension_numbers<[1], [0], [0], [1], [0, 0, 1, 1], [], []>} : vector<8x128xf32>, vector<128x384xf32>, vector<8x384xf32> -> vector<8x384xf32>
    %37 = vector.extract_strided_slice %35 {offsets = [0, 0], sizes = [8, 256], strides = [1, 1]} : vector<8x384xf32> to vector<8x256xf32>
    %38 = vector.extract_strided_slice %36 {offsets = [0, 0], sizes = [8, 256], strides = [1, 1]} : vector<8x384xf32> to vector<8x256xf32>
    %39 = arith.addf %37, %38 : vector<8x256xf32>
    %40 = arith.negf %39 : vector<8x256xf32>
    %41 = math.exp %40 : vector<8x256xf32>
    %cst_14 = arith.constant 1.000000e+00 : f32
    %42 = vector.broadcast %cst_14 : f32 to vector<8x256xf32>
    %43 = arith.addf %42, %41 : vector<8x256xf32>
    %44 = arith.divf %42, %43 : vector<8x256xf32>
    %45 = vector.extract_strided_slice %44 {offsets = [0, 0], sizes = [8, 128], strides = [1, 1]} : vector<8x256xf32> to vector<8x128xf32>
    %46 = vector.extract_strided_slice %44 {offsets = [0, 128], sizes = [8, 128], strides = [1, 1]} : vector<8x256xf32> to vector<8x128xf32>
    %47 = vector.extract_strided_slice %35 {offsets = [0, 256], sizes = [8, 128], strides = [1, 1]} : vector<8x384xf32> to vector<8x128xf32>
    %48 = vector.extract_strided_slice %36 {offsets = [0, 256], sizes = [8, 128], strides = [1, 1]} : vector<8x384xf32> to vector<8x128xf32>
    %49 = arith.addf %48, %6 : vector<8x128xf32>
    %50 = arith.mulf %45, %49 : vector<8x128xf32>
    %51 = arith.addf %47, %50 : vector<8x128xf32>
    %52 = math.tanh %51 : vector<8x128xf32>
    %cst_15 = arith.constant 1.000000e+00 : f32
    %53 = vector.broadcast %cst_15 : f32 to vector<8x128xf32>
    %54 = arith.subf %53, %46 : vector<8x128xf32>
    %55 = arith.mulf %54, %52 : vector<8x128xf32>
    %56 = arith.mulf %46, %32 : vector<8x128xf32>
    %57 = arith.addf %55, %56 : vector<8x128xf32>
    %c2_i32 = arith.constant 2 : i32
    %58 = arith.index_cast %c2_i32 : i32 to index
    %c0_16 = arith.constant 0 : index
    %c0_17 = arith.constant 0 : index
    %59 = vector.load %arg2[%58, %c0_16, %c0_17] : memref<8x8x384xf32, #tpu.memory_space<vmem>>, vector<1x8x384xf32>
    %60 = vector.shape_cast %59 : vector<1x8x384xf32> to vector<8x384xf32>
    %cst_18 = arith.constant dense<0.000000e+00> : vector<8x384xf32>
    %61 = tpu.matmul %57, %3, %cst_18 {dimension_numbers = #tpu.dot_dimension_numbers<[1], [0], [0], [1], [0, 0, 1, 1], [], []>} : vector<8x128xf32>, vector<128x384xf32>, vector<8x384xf32> -> vector<8x384xf32>
    %62 = vector.extract_strided_slice %60 {offsets = [0, 0], sizes = [8, 256], strides = [1, 1]} : vector<8x384xf32> to vector<8x256xf32>
    %63 = vector.extract_strided_slice %61 {offsets = [0, 0], sizes = [8, 256], strides = [1, 1]} : vector<8x384xf32> to vector<8x256xf32>
    %64 = arith.addf %62, %63 : vector<8x256xf32>
    %65 = arith.negf %64 : vector<8x256xf32>
    %66 = math.exp %65 : vector<8x256xf32>
    %cst_19 = arith.constant 1.000000e+00 : f32
    %67 = vector.broadcast %cst_19 : f32 to vector<8x256xf32>
    %68 = arith.addf %67, %66 : vector<8x256xf32>
    %69 = arith.divf %67, %68 : vector<8x256xf32>
    %70 = vector.extract_strided_slice %69 {offsets = [0, 0], sizes = [8, 128], strides = [1, 1]} : vector<8x256xf32> to vector<8x128xf32>
    %71 = vector.extract_strided_slice %69 {offsets = [0, 128], sizes = [8, 128], strides = [1, 1]} : vector<8x256xf32> to vector<8x128xf32>
    %72 = vector.extract_strided_slice %60 {offsets = [0, 256], sizes = [8, 128], strides = [1, 1]} : vector<8x384xf32> to vector<8x128xf32>
    %73 = vector.extract_strided_slice %61 {offsets = [0, 256], sizes = [8, 128], strides = [1, 1]} : vector<8x384xf32> to vector<8x128xf32>
    %74 = arith.addf %73, %6 : vector<8x128xf32>
    %75 = arith.mulf %70, %74 : vector<8x128xf32>
    %76 = arith.addf %72, %75 : vector<8x128xf32>
    %77 = math.tanh %76 : vector<8x128xf32>
    %cst_20 = arith.constant 1.000000e+00 : f32
    %78 = vector.broadcast %cst_20 : f32 to vector<8x128xf32>
    %79 = arith.subf %78, %71 : vector<8x128xf32>
    %80 = arith.mulf %79, %77 : vector<8x128xf32>
    %81 = arith.mulf %71, %57 : vector<8x128xf32>
    %82 = arith.addf %80, %81 : vector<8x128xf32>
    %c3_i32 = arith.constant 3 : i32
    %83 = arith.index_cast %c3_i32 : i32 to index
    %c0_21 = arith.constant 0 : index
    %c0_22 = arith.constant 0 : index
    %84 = vector.load %arg2[%83, %c0_21, %c0_22] : memref<8x8x384xf32, #tpu.memory_space<vmem>>, vector<1x8x384xf32>
    %85 = vector.shape_cast %84 : vector<1x8x384xf32> to vector<8x384xf32>
    %cst_23 = arith.constant dense<0.000000e+00> : vector<8x384xf32>
    %86 = tpu.matmul %82, %3, %cst_23 {dimension_numbers = #tpu.dot_dimension_numbers<[1], [0], [0], [1], [0, 0, 1, 1], [], []>} : vector<8x128xf32>, vector<128x384xf32>, vector<8x384xf32> -> vector<8x384xf32>
    %87 = vector.extract_strided_slice %85 {offsets = [0, 0], sizes = [8, 256], strides = [1, 1]} : vector<8x384xf32> to vector<8x256xf32>
    %88 = vector.extract_strided_slice %86 {offsets = [0, 0], sizes = [8, 256], strides = [1, 1]} : vector<8x384xf32> to vector<8x256xf32>
    %89 = arith.addf %87, %88 : vector<8x256xf32>
    %90 = arith.negf %89 : vector<8x256xf32>
    %91 = math.exp %90 : vector<8x256xf32>
    %cst_24 = arith.constant 1.000000e+00 : f32
    %92 = vector.broadcast %cst_24 : f32 to vector<8x256xf32>
    %93 = arith.addf %92, %91 : vector<8x256xf32>
    %94 = arith.divf %92, %93 : vector<8x256xf32>
    %95 = vector.extract_strided_slice %94 {offsets = [0, 0], sizes = [8, 128], strides = [1, 1]} : vector<8x256xf32> to vector<8x128xf32>
    %96 = vector.extract_strided_slice %94 {offsets = [0, 128], sizes = [8, 128], strides = [1, 1]} : vector<8x256xf32> to vector<8x128xf32>
    %97 = vector.extract_strided_slice %85 {offsets = [0, 256], sizes = [8, 128], strides = [1, 1]} : vector<8x384xf32> to vector<8x128xf32>
    %98 = vector.extract_strided_slice %86 {offsets = [0, 256], sizes = [8, 128], strides = [1, 1]} : vector<8x384xf32> to vector<8x128xf32>
    %99 = arith.addf %98, %6 : vector<8x128xf32>
    %100 = arith.mulf %95, %99 : vector<8x128xf32>
    %101 = arith.addf %97, %100 : vector<8x128xf32>
    %102 = math.tanh %101 : vector<8x128xf32>
    %cst_25 = arith.constant 1.000000e+00 : f32
    %103 = vector.broadcast %cst_25 : f32 to vector<8x128xf32>
    %104 = arith.subf %103, %96 : vector<8x128xf32>
    %105 = arith.mulf %104, %102 : vector<8x128xf32>
    %106 = arith.mulf %96, %82 : vector<8x128xf32>
    %107 = arith.addf %105, %106 : vector<8x128xf32>
    %c4_i32 = arith.constant 4 : i32
    %108 = arith.index_cast %c4_i32 : i32 to index
    %c0_26 = arith.constant 0 : index
    %c0_27 = arith.constant 0 : index
    %109 = vector.load %arg2[%108, %c0_26, %c0_27] : memref<8x8x384xf32, #tpu.memory_space<vmem>>, vector<1x8x384xf32>
    %110 = vector.shape_cast %109 : vector<1x8x384xf32> to vector<8x384xf32>
    %cst_28 = arith.constant dense<0.000000e+00> : vector<8x384xf32>
    %111 = tpu.matmul %107, %3, %cst_28 {dimension_numbers = #tpu.dot_dimension_numbers<[1], [0], [0], [1], [0, 0, 1, 1], [], []>} : vector<8x128xf32>, vector<128x384xf32>, vector<8x384xf32> -> vector<8x384xf32>
    %112 = vector.extract_strided_slice %110 {offsets = [0, 0], sizes = [8, 256], strides = [1, 1]} : vector<8x384xf32> to vector<8x256xf32>
    %113 = vector.extract_strided_slice %111 {offsets = [0, 0], sizes = [8, 256], strides = [1, 1]} : vector<8x384xf32> to vector<8x256xf32>
    %114 = arith.addf %112, %113 : vector<8x256xf32>
    %115 = arith.negf %114 : vector<8x256xf32>
    %116 = math.exp %115 : vector<8x256xf32>
    %cst_29 = arith.constant 1.000000e+00 : f32
    %117 = vector.broadcast %cst_29 : f32 to vector<8x256xf32>
    %118 = arith.addf %117, %116 : vector<8x256xf32>
    %119 = arith.divf %117, %118 : vector<8x256xf32>
    %120 = vector.extract_strided_slice %119 {offsets = [0, 0], sizes = [8, 128], strides = [1, 1]} : vector<8x256xf32> to vector<8x128xf32>
    %121 = vector.extract_strided_slice %119 {offsets = [0, 128], sizes = [8, 128], strides = [1, 1]} : vector<8x256xf32> to vector<8x128xf32>
    %122 = vector.extract_strided_slice %110 {offsets = [0, 256], sizes = [8, 128], strides = [1, 1]} : vector<8x384xf32> to vector<8x128xf32>
    %123 = vector.extract_strided_slice %111 {offsets = [0, 256], sizes = [8, 128], strides = [1, 1]} : vector<8x384xf32> to vector<8x128xf32>
    %124 = arith.addf %123, %6 : vector<8x128xf32>
    %125 = arith.mulf %120, %124 : vector<8x128xf32>
    %126 = arith.addf %122, %125 : vector<8x128xf32>
    %127 = math.tanh %126 : vector<8x128xf32>
    %cst_30 = arith.constant 1.000000e+00 : f32
    %128 = vector.broadcast %cst_30 : f32 to vector<8x128xf32>
    %129 = arith.subf %128, %121 : vector<8x128xf32>
    %130 = arith.mulf %129, %127 : vector<8x128xf32>
    %131 = arith.mulf %121, %107 : vector<8x128xf32>
    %132 = arith.addf %130, %131 : vector<8x128xf32>
    %c5_i32 = arith.constant 5 : i32
    %133 = arith.index_cast %c5_i32 : i32 to index
    %c0_31 = arith.constant 0 : index
    %c0_32 = arith.constant 0 : index
    %134 = vector.load %arg2[%133, %c0_31, %c0_32] : memref<8x8x384xf32, #tpu.memory_space<vmem>>, vector<1x8x384xf32>
    %135 = vector.shape_cast %134 : vector<1x8x384xf32> to vector<8x384xf32>
    %cst_33 = arith.constant dense<0.000000e+00> : vector<8x384xf32>
    %136 = tpu.matmul %132, %3, %cst_33 {dimension_numbers = #tpu.dot_dimension_numbers<[1], [0], [0], [1], [0, 0, 1, 1], [], []>} : vector<8x128xf32>, vector<128x384xf32>, vector<8x384xf32> -> vector<8x384xf32>
    %137 = vector.extract_strided_slice %135 {offsets = [0, 0], sizes = [8, 256], strides = [1, 1]} : vector<8x384xf32> to vector<8x256xf32>
    %138 = vector.extract_strided_slice %136 {offsets = [0, 0], sizes = [8, 256], strides = [1, 1]} : vector<8x384xf32> to vector<8x256xf32>
    %139 = arith.addf %137, %138 : vector<8x256xf32>
    %140 = arith.negf %139 : vector<8x256xf32>
    %141 = math.exp %140 : vector<8x256xf32>
    %cst_34 = arith.constant 1.000000e+00 : f32
    %142 = vector.broadcast %cst_34 : f32 to vector<8x256xf32>
    %143 = arith.addf %142, %141 : vector<8x256xf32>
    %144 = arith.divf %142, %143 : vector<8x256xf32>
    %145 = vector.extract_strided_slice %144 {offsets = [0, 0], sizes = [8, 128], strides = [1, 1]} : vector<8x256xf32> to vector<8x128xf32>
    %146 = vector.extract_strided_slice %144 {offsets = [0, 128], sizes = [8, 128], strides = [1, 1]} : vector<8x256xf32> to vector<8x128xf32>
    %147 = vector.extract_strided_slice %135 {offsets = [0, 256], sizes = [8, 128], strides = [1, 1]} : vector<8x384xf32> to vector<8x128xf32>
    %148 = vector.extract_strided_slice %136 {offsets = [0, 256], sizes = [8, 128], strides = [1, 1]} : vector<8x384xf32> to vector<8x128xf32>
    %149 = arith.addf %148, %6 : vector<8x128xf32>
    %150 = arith.mulf %145, %149 : vector<8x128xf32>
    %151 = arith.addf %147, %150 : vector<8x128xf32>
    %152 = math.tanh %151 : vector<8x128xf32>
    %cst_35 = arith.constant 1.000000e+00 : f32
    %153 = vector.broadcast %cst_35 : f32 to vector<8x128xf32>
    %154 = arith.subf %153, %146 : vector<8x128xf32>
    %155 = arith.mulf %154, %152 : vector<8x128xf32>
    %156 = arith.mulf %146, %132 : vector<8x128xf32>
    %157 = arith.addf %155, %156 : vector<8x128xf32>
    %c6_i32 = arith.constant 6 : i32
    %158 = arith.index_cast %c6_i32 : i32 to index
    %c0_36 = arith.constant 0 : index
    %c0_37 = arith.constant 0 : index
    %159 = vector.load %arg2[%158, %c0_36, %c0_37] : memref<8x8x384xf32, #tpu.memory_space<vmem>>, vector<1x8x384xf32>
    %160 = vector.shape_cast %159 : vector<1x8x384xf32> to vector<8x384xf32>
    %cst_38 = arith.constant dense<0.000000e+00> : vector<8x384xf32>
    %161 = tpu.matmul %157, %3, %cst_38 {dimension_numbers = #tpu.dot_dimension_numbers<[1], [0], [0], [1], [0, 0, 1, 1], [], []>} : vector<8x128xf32>, vector<128x384xf32>, vector<8x384xf32> -> vector<8x384xf32>
    %162 = vector.extract_strided_slice %160 {offsets = [0, 0], sizes = [8, 256], strides = [1, 1]} : vector<8x384xf32> to vector<8x256xf32>
    %163 = vector.extract_strided_slice %161 {offsets = [0, 0], sizes = [8, 256], strides = [1, 1]} : vector<8x384xf32> to vector<8x256xf32>
    %164 = arith.addf %162, %163 : vector<8x256xf32>
    %165 = arith.negf %164 : vector<8x256xf32>
    %166 = math.exp %165 : vector<8x256xf32>
    %cst_39 = arith.constant 1.000000e+00 : f32
    %167 = vector.broadcast %cst_39 : f32 to vector<8x256xf32>
    %168 = arith.addf %167, %166 : vector<8x256xf32>
    %169 = arith.divf %167, %168 : vector<8x256xf32>
    %170 = vector.extract_strided_slice %169 {offsets = [0, 0], sizes = [8, 128], strides = [1, 1]} : vector<8x256xf32> to vector<8x128xf32>
    %171 = vector.extract_strided_slice %169 {offsets = [0, 128], sizes = [8, 128], strides = [1, 1]} : vector<8x256xf32> to vector<8x128xf32>
    %172 = vector.extract_strided_slice %160 {offsets = [0, 256], sizes = [8, 128], strides = [1, 1]} : vector<8x384xf32> to vector<8x128xf32>
    %173 = vector.extract_strided_slice %161 {offsets = [0, 256], sizes = [8, 128], strides = [1, 1]} : vector<8x384xf32> to vector<8x128xf32>
    %174 = arith.addf %173, %6 : vector<8x128xf32>
    %175 = arith.mulf %170, %174 : vector<8x128xf32>
    %176 = arith.addf %172, %175 : vector<8x128xf32>
    %177 = math.tanh %176 : vector<8x128xf32>
    %cst_40 = arith.constant 1.000000e+00 : f32
    %178 = vector.broadcast %cst_40 : f32 to vector<8x128xf32>
    %179 = arith.subf %178, %171 : vector<8x128xf32>
    %180 = arith.mulf %179, %177 : vector<8x128xf32>
    %181 = arith.mulf %171, %157 : vector<8x128xf32>
    %182 = arith.addf %180, %181 : vector<8x128xf32>
    %c7_i32 = arith.constant 7 : i32
    %183 = arith.index_cast %c7_i32 : i32 to index
    %c0_41 = arith.constant 0 : index
    %c0_42 = arith.constant 0 : index
    %184 = vector.load %arg2[%183, %c0_41, %c0_42] : memref<8x8x384xf32, #tpu.memory_space<vmem>>, vector<1x8x384xf32>
    %185 = vector.shape_cast %184 : vector<1x8x384xf32> to vector<8x384xf32>
    %cst_43 = arith.constant dense<0.000000e+00> : vector<8x384xf32>
    %186 = tpu.matmul %182, %3, %cst_43 {dimension_numbers = #tpu.dot_dimension_numbers<[1], [0], [0], [1], [0, 0, 1, 1], [], []>} : vector<8x128xf32>, vector<128x384xf32>, vector<8x384xf32> -> vector<8x384xf32>
    %187 = vector.extract_strided_slice %185 {offsets = [0, 0], sizes = [8, 256], strides = [1, 1]} : vector<8x384xf32> to vector<8x256xf32>
    %188 = vector.extract_strided_slice %186 {offsets = [0, 0], sizes = [8, 256], strides = [1, 1]} : vector<8x384xf32> to vector<8x256xf32>
    %189 = arith.addf %187, %188 : vector<8x256xf32>
    %190 = arith.negf %189 : vector<8x256xf32>
    %191 = math.exp %190 : vector<8x256xf32>
    %cst_44 = arith.constant 1.000000e+00 : f32
    %192 = vector.broadcast %cst_44 : f32 to vector<8x256xf32>
    %193 = arith.addf %192, %191 : vector<8x256xf32>
    %194 = arith.divf %192, %193 : vector<8x256xf32>
    %195 = vector.extract_strided_slice %194 {offsets = [0, 0], sizes = [8, 128], strides = [1, 1]} : vector<8x256xf32> to vector<8x128xf32>
    %196 = vector.extract_strided_slice %194 {offsets = [0, 128], sizes = [8, 128], strides = [1, 1]} : vector<8x256xf32> to vector<8x128xf32>
    %197 = vector.extract_strided_slice %185 {offsets = [0, 256], sizes = [8, 128], strides = [1, 1]} : vector<8x384xf32> to vector<8x128xf32>
    %198 = vector.extract_strided_slice %186 {offsets = [0, 256], sizes = [8, 128], strides = [1, 1]} : vector<8x384xf32> to vector<8x128xf32>
    %199 = arith.addf %198, %6 : vector<8x128xf32>
    %200 = arith.mulf %195, %199 : vector<8x128xf32>
    %201 = arith.addf %197, %200 : vector<8x128xf32>
    %202 = math.tanh %201 : vector<8x128xf32>
    %cst_45 = arith.constant 1.000000e+00 : f32
    %203 = vector.broadcast %cst_45 : f32 to vector<8x128xf32>
    %204 = arith.subf %203, %196 : vector<8x128xf32>
    %205 = arith.mulf %204, %202 : vector<8x128xf32>
    %206 = arith.mulf %196, %182 : vector<8x128xf32>
    %207 = arith.addf %205, %206 : vector<8x128xf32>
    %c8_i32 = arith.constant 8 : i32
    %c0_46 = arith.constant 0 : index
    %c0_47 = arith.constant 0 : index
    %208 = vector.load %arg6[%c0_46, %c0_47] : memref<8x128xf32, #tpu.memory_space<vmem>>, vector<8x128xf32>
    tpu.vector_store %arg6[%c0_46, %c0_47], %207 {strides = array<i32>} : memref<8x128xf32, #tpu.memory_space<vmem>>, vector<8x128xf32>,
    %c0_i32_48 = arith.constant 0 : i32
    %209 = arith.cmpi eq, %arg1, %c0_i32_48 : i32
    %210 = arith.extui %209 : i1 to i32
    %c0_i32_49 = arith.constant 0 : i32
    %211 = arith.cmpi ne, %210, %c0_i32_49 : i32
    scf.if %211 {
      %c0_50 = arith.constant 0 : index
      %c0_51 = arith.constant 0 : index
      %212 = vector.load %arg6[%c0_50, %c0_51] : memref<8x128xf32, #tpu.memory_space<vmem>>, vector<8x128xf32>
      %c0_52 = arith.constant 0 : index
      %c0_53 = arith.constant 0 : index
      %213 = vector.load %arg5[%c0_52, %c0_53] : memref<8x128xf32, #tpu.memory_space<vmem>>, vector<8x128xf32>
      tpu.vector_store %arg5[%c0_52, %c0_53], %212 {strides = array<i32>} : memref<8x128xf32, #tpu.memory_space<vmem>>, vector<8x128xf32>,
    } else {
    }
    return
  }
  func.func @transform_0(%arg0: i32, %arg1: i32) -> (i32, i32, i32) {
    %c0_i32 = arith.constant 0 : i32
    %c0_i32_0 = arith.constant 0 : i32
    return %arg1, %arg0, %c0_i32 : i32, i32, i32
  }
  func.func @transform_1(%arg0: i32, %arg1: i32) -> (i32, i32) {
    %c0_i32 = arith.constant 0 : i32
    %c0_i32_0 = arith.constant 0 : i32
    %c0_i32_1 = arith.constant 0 : i32
    return %c0_i32, %c0_i32_0 : i32, i32
  }
  func.func @transform_2(%arg0: i32, %arg1: i32) -> (i32, i32) {
    %c0_i32 = arith.constant 0 : i32
    %c0_i32_0 = arith.constant 0 : i32
    %c0_i32_1 = arith.constant 0 : i32
    return %c0_i32, %c0_i32_0 : i32, i32
  }
  func.func @transform_3(%arg0: i32, %arg1: i32) -> (i32, i32) {
    %c0_i32 = arith.constant 0 : i32
    %c0_i32_0 = arith.constant 0 : i32
    return %arg0, %c0_i32 : i32, i32
  }
}

</mosaic_0001>

<bundles_post_ra>
// kernel: tpu_custom_call.1
= control target key start
LH: loop header
LB: loop body
LE: loop exit
PB: predicated region body
PF: predicated region fallthrough
CT: control target
= control target key end

     0   :  { %8 = vsyncpa [#allocation4], 0  ;;  %s1813_s0 = inlined_call_operand.hbm [shape: f32[8,8,384], index: 0, kind: input, shape index: {}]   ;;  %s1814_s1 = inlined_call_operand.hbm [shape: f32[128,384], index: 1, kind: input, shape index: {}]   ;;  %s1815_s2 = inlined_call_operand.vmem [shape: f32[1,128], index: 2, kind: input, shape index: {}]   ;;  %s1816_s3 = inlined_call_operand.hbm [shape: f32[8,128], index: 3, kind: output, shape index: {}]  }
   0x1   :  { %9 = vsyncpa [#allocation7], 0 }
   0x2   :  { %10 = vsyncpa [#allocation5], 0  ;;  %s15_s14 = sshll.u32 %s1813_s0, 4  ;;  %s1254_s15 = smov [#allocation3]   ;;  %s16_s14 = int_to_ptr.hbm [resolvable:$true] %s15_s14 }
   0x3   :  { %s17_s16 = sshll.u32 %s1254_s15, 4  ;;  %s28_s19 = sshll.u32 %s1814_s1, 4  ;;  %s18_s16 = int_to_ptr.vmem [resolvable:$true] %s17_s16  ;;  %s29_s19 = int_to_ptr.hbm [resolvable:$true] %s28_s19 }
   0x4   :  { %s1255_s20 = smov 384   ;;  %s1256_s21 = smov 24  }
   0x5   :  { %23 = dma.hbm_to_vmem [thread:$0]  %s16_s14, 3072, %s18_s16, [#allocation4], %s1255_s20, %s1255_s20, %s1256_s21  }
   0x6   :  { %s1257_s22 = smov [#allocation6]  }
   0x7   :  { %s30_s23 = sshll.u32 %s1257_s22, 4  ;;  %s31_s23 = int_to_ptr.vmem [resolvable:$true] %s30_s23 }
   0x8   :  { %36 = dma.hbm_to_vmem [thread:$0]  %s29_s19, 6144, %s31_s23, [#allocation7], %s1255_s20, %s1255_s20, %s1256_s21  }
   0x9   :  { %1248 = dma.done.wait [#allocation4], 3072  }
   0xa   :  { %1249 = vsyncadd [#allocation4], 4294964224 }
   0xb   :  { %1250 = dma.done.wait [#allocation7], 6144  }
   0xc   :  { %1251 = vsyncadd [#allocation7], 4294961152  ;;  %v1286_v0 = vld [vmem:[#allocation6 + $0x168] sm:$0xff]  ;;  %v1288_v1 = vld [vmem:[#allocation6 + $0x170] sm:$0xff]  ;;  %v1258_v44 = vmov 0.0   ;;  %s1013_s29 = sshll.u32 %s1816_s3, 4  ;;  %s1014_s29 = int_to_ptr.hbm [resolvable:$true] %s1013_s29 }
   0xd   :  { %v1290_v2 = vld [vmem:[#allocation6 + $0x150] sm:$0xff]  ;;  %108 = vmatpush.msra.mxu0 %v1286_v0  ;;  %128 = vmatpush.msra.mxu1 %v1288_v1  ;;  %v1294_v3 = vld [vmem:[#allocation6 + $0x158] sm:$0xff]  ;;  %v1298_v5 = vld [vmem:[#allocation6 + $0x140] sm:$0xff] }
   0xe   :  { %v1296_v4 = vld [vmem:[#allocation6 + $0x138] sm:$0xff]  ;;  %220 = vmatpush.msra.mxu3 %v1286_v0  ;;  %v1303_v6 = vld [vmem:[#allocation6 + $0x120] sm:$0xff]  ;;  %v1305_v7 = vld [vmem:[#allocation6 + $0x128] sm:$0xff] }
   0xf   :  { %109 = vmatpush.msra.mxu0 %v1290_v2  ;;  %129 = vmatpush.msra.mxu1 %v1294_v3  ;;  %v1310_v8 = vld [vmem:[#allocation6 + $0x108] sm:$0xff]  ;;  %v1312_v9 = vld [vmem:[#allocation6 + $0x110] sm:$0xff]  ;;  %v1319_v11 = vld [vmem:[#allocation6 + $0xf8] sm:$0xff] }
  0x10   :  { %221 = vmatpush.msra.mxu3 %v1290_v2  ;;  %v1317_v10 = vld [vmem:[#allocation6 + $0xf0] sm:$0xff]  ;;  %v1321_v12 = vld [vmem:[#allocation6 + $0x178] sm:$0xff]  ;;  %v1326_v13 = vld [vmem:[#allocation6 + $0x160] sm:$0xff] }
  0x11   :  { %110 = vmatpush.msra.mxu0 %v1296_v4  ;;  %130 = vmatpush.msra.mxu1 %v1298_v5  ;;  %v1328_v14 = vld [vmem:[#allocation6 + $0xd8] sm:$0xff]  ;;  %v1330_v15 = vld [vmem:[#allocation6 + $0xe0] sm:$0xff]  ;;  %v1336_v16 = vld [vmem:[#allocation6 + $0x148] sm:$0xff] }
  0x12   :  { %222 = vmatpush.msra.mxu3 %v1296_v4  ;;  %148 = vmatpush.msra.mxu2 %v1321_v12  ;;  %v1338_v17 = vld [vmem:[#allocation6 + $0xc0] sm:$0xff]  ;;  %v1340_v18 = vld [vmem:[#allocation6 + $0xc8] sm:$0xff]  ;;  %v1346_v19 = vld [vmem:[#allocation6 + $0x130] sm:$0xff] }
  0x13   :  { %111 = vmatpush.msra.mxu0 %v1303_v6  ;;  %131 = vmatpush.msra.mxu1 %v1305_v7  ;;  %v1348_v20 = vld [vmem:[#allocation6 + $0xa8] sm:$0xff]  ;;  %v1350_v21 = vld [vmem:[#allocation6 + $0xb0] sm:$0xff]  ;;  %v1356_v22 = vld [vmem:[#allocation6 + $0x118] sm:$0xff] }
  0x14   :  { %223 = vmatpush.msra.mxu3 %v1303_v6  ;;  %149 = vmatpush.msra.mxu2 %v1326_v13  ;;  %v1358_v23 = vld [vmem:[#allocation6 + $0x90] sm:$0xff]  ;;  %v1360_v24 = vld [vmem:[#allocation6 + $0x98] sm:$0xff]  ;;  %v1366_v25 = vld [vmem:[#allocation6 + $0x100] sm:$0xff] }
  0x15   :  { %112 = vmatpush.msra.mxu0 %v1310_v8  ;;  %132 = vmatpush.msra.mxu1 %v1312_v9  ;;  %v1368_v26 = vld [vmem:[#allocation6 + $0x78] sm:$0xff]  ;;  %v1370_v27 = vld [vmem:[#allocation6 + $0x80] sm:$0xff]  ;;  %v1376_v28 = vld [vmem:[#allocation6 + $0xe8] sm:$0xff] }
  0x16   :  { %224 = vmatpush.msra.mxu3 %v1310_v8  ;;  %150 = vmatpush.msra.mxu2 %v1336_v16  ;;  %v1378_v29 = vld [vmem:[#allocation6 + $0x60] sm:$0xff]  ;;  %v1380_v30 = vld [vmem:[#allocation6 + $0x68] sm:$0xff]  ;;  %v1386_v31 = vld [vmem:[#allocation6 + $0xd0] sm:$0xff] }
  0x17   :  { %113 = vmatpush.msra.mxu0 %v1317_v10  ;;  %133 = vmatpush.msra.mxu1 %v1319_v11  ;;  %v1388_v32 = vld [vmem:[#allocation6 + $0x48] sm:$0xff]  ;;  %v1390_v33 = vld [vmem:[#allocation6 + $0x50] sm:$0xff]  ;;  %v1396_v34 = vld [vmem:[#allocation6 + $0xb8] sm:$0xff] }
  0x18   :  { %225 = vmatpush.msra.mxu3 %v1317_v10  ;;  %151 = vmatpush.msra.mxu2 %v1346_v19  ;;  %v1398_v35 = vld [vmem:[#allocation6 + $0x30] sm:$0xff]  ;;  %v1400_v36 = vld [vmem:[#allocation6 + $0x38] sm:$0xff]  ;;  %v1406_v37 = vld [vmem:[#allocation6 + $0xa0] sm:$0xff] }
  0x19   :  { %114 = vmatpush.msra.mxu0 %v1328_v14  ;;  %134 = vmatpush.msra.mxu1 %v1330_v15  ;;  %1833 = vst [vmem:[#allocation12_spill] sm:$0xff] %v1398_v35  ;;  %v1408_v38 = vld [vmem:[#allocation6 + $0x18] sm:$0xff]  ;;  %v1410_v39 = vld [vmem:[#allocation6 + $0x20] sm:$0xff]  ;;  %v1416_v40 = vld [vmem:[#allocation6 + $0x88] sm:$0xff] }
  0x1a   :  { %226 = vmatpush.msra.mxu3 %v1328_v14  ;;  %152 = vmatpush.msra.mxu2 %v1356_v22  ;;  %1834 = vst [vmem:[#allocation13_spill] sm:$0xff] %v1400_v36  ;;  %v1418_v41 = vld [vmem:[#allocation6] sm:$0xff]  ;;  %v1420_v42 = vld [vmem:[#allocation6 + $0x8] sm:$0xff]  ;;  %v1427_v43 = vld [vmem:[#allocation6 + $0x70] sm:$0xff] }
  0x1b   :  { %115 = vmatpush.msra.mxu0 %v1338_v17  ;;  %135 = vmatpush.msra.mxu1 %v1340_v18  ;;  %1835 = vst [vmem:[#allocation14_spill] sm:$0xff] %v1408_v38  ;;  %v1432_v45 = vld [vmem:[#allocation6 + $0x58] sm:$0xff]  ;;  %v1436_v46 = vld [vmem:[#allocation6 + $0x40] sm:$0xff]  ;;  %v1442_v47 = vld [vmem:[#allocation6 + $0x28] sm:$0xff] }
  0x1c   :  { %227 = vmatpush.msra.mxu3 %v1338_v17  ;;  %153 = vmatpush.msra.mxu2 %v1366_v25  ;;  %1836 = vst [vmem:[#allocation15_spill] sm:$0xff] %v1410_v39  ;;  %v1448_v48 = vld [vmem:[#allocation6 + $0x10] sm:$0xff]  ;;  %v105_v49 = vld [vmem:[#allocation3] sm:$0xff]  ;;  %v106_v50 = vld [vmem:[#allocation3 + $0x8] sm:$0xff] }
  0x1d   :  { %116 = vmatpush.msra.mxu0 %v1348_v20  ;;  %136 = vmatpush.msra.mxu1 %v1350_v21  ;;  %1837 = vst [vmem:[#allocation16_spill] sm:$0xff] %v1418_v41 }
  0x1e   :  { %228 = vmatpush.msra.mxu3 %v1348_v20  ;;  %154 = vmatpush.msra.mxu2 %v1376_v28  ;;  %1838 = vst [vmem:[#allocation17_spill] sm:$0xff] %v1420_v42 }
  0x1f   :  { %117 = vmatpush.msra.mxu0 %v1358_v23  ;;  %137 = vmatpush.msra.mxu1 %v1360_v24  ;;  %1839 = vst [vmem:[#allocation18_spill] sm:$0xff] %v1442_v47 }
  0x20   :  { %229 = vmatpush.msra.mxu3 %v1358_v23  ;;  %155 = vmatpush.msra.mxu2 %v1386_v31  ;;  %1840 = vst [vmem:[#allocation19_spill] sm:$0xff] %v1448_v48 }
  0x21   :  { %118 = vmatpush.msra.mxu0 %v1368_v26  ;;  %138 = vmatpush.msra.mxu1 %v1370_v27 }
  0x22   :  { %230 = vmatpush.msra.mxu3 %v1368_v26  ;;  %156 = vmatpush.msra.mxu2 %v1396_v34 }
  0x23   :  { %119 = vmatpush.msra.mxu0 %v1378_v29  ;;  %139 = vmatpush.msra.mxu1 %v1380_v30 }
  0x24   :  { %231 = vmatpush.msra.mxu3 %v1378_v29  ;;  %157 = vmatpush.msra.mxu2 %v1406_v37 }
  0x25   :  { %120 = vmatpush.msra.mxu0 %v1388_v32  ;;  %140 = vmatpush.msra.mxu1 %v1390_v33 }
  0x26   :  { %232 = vmatpush.msra.mxu3 %v1388_v32  ;;  %158 = vmatpush.msra.mxu2 %v1416_v40 }
  0x27   :  { %121 = vmatpush.msra.mxu0 %v1398_v35  ;;  %141 = vmatpush.msra.mxu1 %v1400_v36 }
  0x28   :  { %233 = vmatpush.msra.mxu3 %v1398_v35  ;;  %159 = vmatpush.msra.mxu2 %v1427_v43 }
  0x29   :  { %122 = vmatpush.msra.mxu0 %v1408_v38  ;;  %142 = vmatpush.msra.mxu1 %v1410_v39 }
  0x2a   :  { %234 = vmatpush.msra.mxu3 %v1408_v38  ;;  %160 = vmatpush.msra.mxu2 %v1432_v45 }
  0x2b   :  { %123 = vmatpush.msra.mxu0 %v1418_v41  ;;  %143 = vmatpush.msra.mxu1 %v1420_v42 }
  0x2c   :  { %124 = vmatmul.f32.vlgmr.msra.gmra.mxu0 %v1258_v44  ;;  %144 = vmatmul.f32.vlgmr.msra.gmra.mxu1 %v1258_v44 }
  0x2d   :  { %240 = vmatpush.msrb.mxu0 %v1288_v1  ;;  %260 = vmatpush.msrb.mxu1 %v1321_v12 }
  0x2e   :  { %235 = vmatpush.msra.mxu3 %v1418_v41  ;;  %161 = vmatpush.msra.mxu2 %v1436_v46 }
  0x2f   :  { %241 = vmatpush.msrb.mxu0 %v1294_v3  ;;  %261 = vmatpush.msrb.mxu1 %v1326_v13 }
  0x30   :  { %352 = vmatpush.msrb.mxu3 %v1288_v1  ;;  %162 = vmatpush.msra.mxu2 %v1442_v47 }
  0x31   :  { %242 = vmatpush.msrb.mxu0 %v1298_v5  ;;  %262 = vmatpush.msrb.mxu1 %v1336_v16 }
  0x32   :  { %353 = vmatpush.msrb.mxu3 %v1294_v3  ;;  %163 = vmatpush.msra.mxu2 %v1448_v48 }
  0x33   :  { %243 = vmatpush.msrb.mxu0 %v1305_v7  ;;  %263 = vmatpush.msrb.mxu1 %v1346_v19 }
  0x34   :  { %354 = vmatpush.msrb.mxu3 %v1298_v5  ;;  %164 = vmatmul.f32.vlgmr.msra.gmra.mxu2 %v1258_v44 }
  0x35   :  { %244 = vmatpush.msrb.mxu0 %v1312_v9  ;;  %264 = vmatpush.msrb.mxu1 %v1356_v22 }
  0x36   :  { %332 = vmatpush.msrb.mxu2 %v1286_v0  ;;  %355 = vmatpush.msrb.mxu3 %v1305_v7 }
  0x37   :  { %245 = vmatpush.msrb.mxu0 %v1319_v11  ;;  %265 = vmatpush.msrb.mxu1 %v1366_v25 }
  0x38   :  { %333 = vmatpush.msrb.mxu2 %v1290_v2  ;;  %356 = vmatpush.msrb.mxu3 %v1312_v9 }
  0x39   :  { %246 = vmatpush.msrb.mxu0 %v1330_v15  ;;  %266 = vmatpush.msrb.mxu1 %v1376_v28 }
  0x3a   :  { %334 = vmatpush.msrb.mxu2 %v1296_v4  ;;  %357 = vmatpush.msrb.mxu3 %v1319_v11 }
  0x3b   :  { %247 = vmatpush.msrb.mxu0 %v1340_v18  ;;  %267 = vmatpush.msrb.mxu1 %v1386_v31 }
  0x3c   :  { %335 = vmatpush.msrb.mxu2 %v1303_v6  ;;  %358 = vmatpush.msrb.mxu3 %v1330_v15 }
  0x3d   :  { %248 = vmatpush.msrb.mxu0 %v1350_v21  ;;  %268 = vmatpush.msrb.mxu1 %v1396_v34 }
  0x3e   :  { %336 = vmatpush.msrb.mxu2 %v1310_v8  ;;  %359 = vmatpush.msrb.mxu3 %v1340_v18 }
  0x3f   :  { %249 = vmatpush.msrb.mxu0 %v1360_v24  ;;  %269 = vmatpush.msrb.mxu1 %v1406_v37 }
  0x40   :  { %337 = vmatpush.msrb.mxu2 %v1317_v10  ;;  %360 = vmatpush.msrb.mxu3 %v1350_v21 }
  0x41   :  { %250 = vmatpush.msrb.mxu0 %v1370_v27  ;;  %270 = vmatpush.msrb.mxu1 %v1416_v40 }
  0x42   :  { %338 = vmatpush.msrb.mxu2 %v1328_v14  ;;  %361 = vmatpush.msrb.mxu3 %v1360_v24 }
  0x43   :  { %251 = vmatpush.msrb.mxu0 %v1380_v30  ;;  %271 = vmatpush.msrb.mxu1 %v1427_v43 }
  0x44   :  { %339 = vmatpush.msrb.mxu2 %v1338_v17  ;;  %362 = vmatpush.msrb.mxu3 %v1370_v27 }
  0x45   :  { %252 = vmatpush.msrb.mxu0 %v1390_v33  ;;  %272 = vmatpush.msrb.mxu1 %v1432_v45 }
  0x46   :  { %340 = vmatpush.msrb.mxu2 %v1348_v20  ;;  %363 = vmatpush.msrb.mxu3 %v1380_v30 }
  0x47   :  { %253 = vmatpush.msrb.mxu0 %v1400_v36  ;;  %273 = vmatpush.msrb.mxu1 %v1436_v46 }
  0x48   :  { %341 = vmatpush.msrb.mxu2 %v1358_v23  ;;  %364 = vmatpush.msrb.mxu3 %v1390_v33 }
  0x49   :  { %254 = vmatpush.msrb.mxu0 %v1410_v39  ;;  %274 = vmatpush.msrb.mxu1 %v1442_v47 }
  0x4a   :  { %342 = vmatpush.msrb.mxu2 %v1368_v26  ;;  %365 = vmatpush.msrb.mxu3 %v1400_v36 }
  0x4b   :  { %255 = vmatpush.msrb.mxu0 %v1420_v42  ;;  %275 = vmatpush.msrb.mxu1 %v1448_v48 }
  0x4c   :  { %343 = vmatpush.msrb.mxu2 %v1378_v29  ;;  %366 = vmatpush.msrb.mxu3 %v1410_v39 }
  0x4d   :  { %372 = vmatpush.msra.mxu0 %v1321_v12  ;;  %444 = vmatpush.msra.mxu1 %v1286_v0 }
  0x4e   :  { %344 = vmatpush.msrb.mxu2 %v1388_v32  ;;  %367 = vmatpush.msrb.mxu3 %v1420_v42 }
  0x4f   :  { %373 = vmatpush.msra.mxu0 %v1326_v13  ;;  %445 = vmatpush.msra.mxu1 %v1290_v2 }
  0x50   :  { %345 = vmatpush.msrb.mxu2 %v1398_v35 }
  0x51   :  { %374 = vmatpush.msra.mxu0 %v1336_v16  ;;  %446 = vmatpush.msra.mxu1 %v1296_v4 }
  0x52   :  { %346 = vmatpush.msrb.mxu2 %v1408_v38 }
  0x53   :  { %375 = vmatpush.msra.mxu0 %v1346_v19  ;;  %447 = vmatpush.msra.mxu1 %v1303_v6 }
  0x54   :  { %347 = vmatpush.msrb.mxu2 %v1418_v41 }
  0x55   :  { %376 = vmatpush.msra.mxu0 %v1356_v22  ;;  %448 = vmatpush.msra.mxu1 %v1310_v8 }
  0x56   :  { %464 = vmatpush.msra.mxu2 %v1288_v1 }
  0x57   :  { %377 = vmatpush.msra.mxu0 %v1366_v25  ;;  %449 = vmatpush.msra.mxu1 %v1317_v10 }
  0x58   :  { %465 = vmatpush.msra.mxu2 %v1294_v3 }
  0x59   :  { %378 = vmatpush.msra.mxu0 %v1376_v28  ;;  %450 = vmatpush.msra.mxu1 %v1328_v14 }
  0x5a   :  { %466 = vmatpush.msra.mxu2 %v1298_v5 }
  0x5b   :  { %379 = vmatpush.msra.mxu0 %v1386_v31  ;;  %451 = vmatpush.msra.mxu1 %v1338_v17 }
  0x5c   :  { %467 = vmatpush.msra.mxu2 %v1305_v7 }
  0x5d   :  { %380 = vmatpush.msra.mxu0 %v1396_v34  ;;  %452 = vmatpush.msra.mxu1 %v1348_v20 }
  0x5e   :  { %468 = vmatpush.msra.mxu2 %v1312_v9 }
  0x5f   :  { %381 = vmatpush.msra.mxu0 %v1406_v37  ;;  %453 = vmatpush.msra.mxu1 %v1358_v23 }
  0x60   :  { %469 = vmatpush.msra.mxu2 %v1319_v11 }
  0x61   :  { %382 = vmatpush.msra.mxu0 %v1416_v40  ;;  %454 = vmatpush.msra.mxu1 %v1368_v26 }
  0x62   :  { %470 = vmatpush.msra.mxu2 %v1330_v15 }
  0x63   :  { %383 = vmatpush.msra.mxu0 %v1427_v43  ;;  %455 = vmatpush.msra.mxu1 %v1378_v29 }
  0x64   :  { %471 = vmatpush.msra.mxu2 %v1340_v18 }
  0x65   :  { %384 = vmatpush.msra.mxu0 %v1432_v45  ;;  %456 = vmatpush.msra.mxu1 %v1388_v32 }
  0x66   :  { %472 = vmatpush.msra.mxu2 %v1350_v21 }
  0x67   :  { %385 = vmatpush.msra.mxu0 %v1436_v46  ;;  %457 = vmatpush.msra.mxu1 %v1398_v35 }
  0x68   :  { %473 = vmatpush.msra.mxu2 %v1360_v24 }
  0x69   :  { %386 = vmatpush.msra.mxu0 %v1442_v47  ;;  %458 = vmatpush.msra.mxu1 %v1408_v38 }
  0x6a   :  { %474 = vmatpush.msra.mxu2 %v1370_v27 }
  0x6b   :  { %387 = vmatpush.msra.mxu0 %v1448_v48  ;;  %459 = vmatpush.msra.mxu1 %v1418_v41  ;;  %v107_v48 = vld [vmem:[#allocation3 + $0x10] sm:$0xff] }
  0x6c   :  { %475 = vmatpush.msra.mxu2 %v1380_v30 }
  0x6e   :  { %476 = vmatpush.msra.mxu2 %v1390_v33 }
  0x70   :  { %477 = vmatpush.msra.mxu2 %v1400_v36 }
  0x72   :  { %478 = vmatpush.msra.mxu2 %v1410_v39 }
  0x74   :  { %479 = vmatpush.msra.mxu2 %v1420_v42  ;;  %v1561_v42 = vld [vmem:[%s1815_s2] ss:$0 sm:$0xff] }
  0xa9   :  { %v125_v51 = vpop.f32.mrf.mxu0  ;;  %v145_v52 = vpop.f32.mrf.mxu1 }
  0xaa   :  { %v168_v53 = vadd.f32 %v125_v51, %v105_v49  ;;  %v169_v54 = vadd.f32 %v145_v52, %v106_v50 }
  0xac   :  { %v1024_v55 = vmul.f32 -1.442695, %v168_v53  ;;  %v1025_v56 = vmul.f32 -1.442695, %v169_v54 }
  0xae   :  { %1047 = vpow2.f32 %v1024_v55 }
  0xaf   :  { %1049 = vpow2.f32 %v1025_v56 }
  0xb4   :  { %v1048_v57 = vpop.eup %1047 }
  0xb5   :  { %v1050_v58 = vpop.eup %1049  ;;  %v176_v59 = vadd.f32 1.0, %v1048_v57 }
  0xb6   :  { %v177_v60 = vadd.f32 1.0, %v1050_v58 }
  0xb7   :  { %1051 = vrcp.f32 %v176_v59  ;;  %v165_v51 = vpop.f32.mrf.mxu2  ;;  %v189_v52 = vand.u32 2147483648, %v176_v59  ;;  %v187_v54 = vand.u32 2147483647, %v176_v59  ;;  %vm183_vm1 = vweird.f32 %v176_v59 }
  0xb8   :  { %1053 = vrcp.f32 %v177_v60  ;;  %v208_v57 = vadd.f32 %v1561_v42, %v165_v51  ;;  %vm198_vm4 = vweird.f32 %v177_v60  ;;  %v202_v47 = vand.u32 2147483647, %v177_v60 }
  0xb9   :  { %v190_v58 = vor.u32 1.1754944e-38, %v189_v52  ;;  %vm188_vm3 = vcmp.eq.f32.partialorder %v187_v54, 8.507059e+37 }
  0xba   :  { %vm203_vm7 = vcmp.eq.f32.partialorder %v202_v47, 8.507059e+37  ;;  %v1845_v47 = vld [vmem:[#allocation19_spill] sm:$0xff] }
  0xbd   :  { %v1052_v61 = vpop.eup %1051 }
  0xbe   :  { %v1054_v62 = vpop.eup %1053  ;;  %v179_v63 = vmul.f32 %v1052_v61, %v176_v59  ;;  %vm184_vm0 = vweird.f32 %v1052_v61 }
  0xbf   :  { %v194_v44 = vmul.f32 %v1054_v62, %v177_v60  ;;  %vm185_vm2 = vmor %vm183_vm1, %vm184_vm0  ;;  %vm199_vm5 = vweird.f32 %v1054_v62 }
  0xc0   :  { %v180_v49 = vsub.f32 1.0, %v179_v63  ;;  %vm200_vm6 = vmor %vm198_vm4, %vm199_vm5 }
  0xc1   :  { %v195_v50 = vsub.f32 1.0, %v194_v44  ;;  %v204_v44 = vand.u32 2147483648, %v177_v60  ;;  %v1847_v60 = vld [vmem:[#allocation17_spill] sm:$0xff] }
  0xc2   :  { %v181_v53 = vmul.f32 %v1052_v61, %v180_v49 }
  0xc3   :  { %v196_v55 = vmul.f32 %v1054_v62, %v195_v50  ;;  %v205_v50 = vor.u32 1.1754944e-38, %v204_v44 }
  0xc4   :  { %v182_v56 = vadd.f32 %v1052_v61, %v181_v53 }
  0xc5   :  { %v197_v38 = vadd.f32 %v1054_v62, %v196_v55 }
  0xc6   :  { %v186_v41 = vsel %vm185_vm2, %v1052_v61, %v182_v56 }
  0xc7   :  { %v191_v39 = vsel %vm188_vm3, %v190_v58, %v186_v41  ;;  %v201_v36 = vsel %vm200_vm6, %v1054_v62, %v197_v38  ;;  %v1842_v38 = vld [vmem:[#allocation18_spill] sm:$0xff]  ;;  %v1844_v41 = vld [vmem:[#allocation15_spill] sm:$0xff] }
  0xc8   :  { %v209_v63 = vmul.f32 %v208_v57, %v191_v39  ;;  %v206_v59 = vsel %vm203_vm7, %v205_v50, %v201_v36  ;;  %v1841_v36 = vld [vmem:[#allocation13_spill] sm:$0xff]  ;;  %v1843_v39 = vld [vmem:[#allocation14_spill] sm:$0xff]  ;;  %v218_v62 = vld [vmem:[#allocation3 + $0x20] sm:$0xff] }
  0xc9   :  { %v212_v51 = vsub.f32 1.0, %v206_v59  ;;  %v214_v61 = vmul.f32 0.0, %v206_v59  ;;  %v217_v58 = vld [vmem:[#allocation3 + $0x18] sm:$0xff] }
  0xca   :  { %v210_v49 = vadd.f32 %v209_v63, %v107_v48  ;;  %v1846_v48 = vld [vmem:[#allocation16_spill] sm:$0xff] }
  0xcc   :  { %1055 = vtanh.f32 %v210_v49 }
  0xd2   :  { %v1056_v53 = vpop.eup %1055 }
  0xd3   :  { %v213_v52 = vmul.f32 %v1056_v53, %v212_v51 }
  0xd5   :  { %v1564_v54 = vadd.f32 %v214_v61, %v213_v52 }
  0xd7   :  { %236 = vmatmul.f32.vlgmr.msra.gmra.mxu3 %v1564_v54  ;;  %256 = vmatmul.f32.vlgmr.msrb.gmra.mxu0 %v1564_v54 }
  0xd8   :  { %276 = vmatmul.f32.vlgmr.msrb.gmra.mxu1 %v1564_v54  ;;  %484 = vmatpush.msra.mxu3 %v1321_v12 }
  0xd9   :  { %556 = vmatpush.msrb.mxu0 %v1286_v0  ;;  %576 = vmatpush.msrb.mxu1 %v1288_v1 }
  0xda   :  { %485 = vmatpush.msra.mxu3 %v1326_v13 }
  0xdb   :  { %557 = vmatpush.msrb.mxu0 %v1290_v2  ;;  %577 = vmatpush.msrb.mxu1 %v1294_v3 }
  0xdc   :  { %486 = vmatpush.msra.mxu3 %v1336_v16 }
  0xdd   :  { %558 = vmatpush.msrb.mxu0 %v1296_v4  ;;  %578 = vmatpush.msrb.mxu1 %v1298_v5 }
  0xde   :  { %487 = vmatpush.msra.mxu3 %v1346_v19 }
  0xdf   :  { %559 = vmatpush.msrb.mxu0 %v1303_v6  ;;  %579 = vmatpush.msrb.mxu1 %v1305_v7 }
  0xe0   :  { %488 = vmatpush.msra.mxu3 %v1356_v22 }
  0xe1   :  { %560 = vmatpush.msrb.mxu0 %v1310_v8  ;;  %580 = vmatpush.msrb.mxu1 %v1312_v9 }
  0xe2   :  { %489 = vmatpush.msra.mxu3 %v1366_v25 }
  0xe3   :  { %561 = vmatpush.msrb.mxu0 %v1317_v10  ;;  %581 = vmatpush.msrb.mxu1 %v1319_v11 }
  0xe4   :  { %490 = vmatpush.msra.mxu3 %v1376_v28 }
  0xe5   :  { %562 = vmatpush.msrb.mxu0 %v1328_v14  ;;  %582 = vmatpush.msrb.mxu1 %v1330_v15 }
  0xe6   :  { %491 = vmatpush.msra.mxu3 %v1386_v31 }
  0xe7   :  { %563 = vmatpush.msrb.mxu0 %v1338_v17  ;;  %583 = vmatpush.msrb.mxu1 %v1340_v18 }
  0xe8   :  { %492 = vmatpush.msra.mxu3 %v1396_v34 }
  0xe9   :  { %564 = vmatpush.msrb.mxu0 %v1348_v20  ;;  %584 = vmatpush.msrb.mxu1 %v1350_v21 }
  0xea   :  { %493 = vmatpush.msra.mxu3 %v1406_v37 }
  0xeb   :  { %565 = vmatpush.msrb.mxu0 %v1358_v23  ;;  %585 = vmatpush.msrb.mxu1 %v1360_v24 }
  0xec   :  { %494 = vmatpush.msra.mxu3 %v1416_v40 }
  0xed   :  { %566 = vmatpush.msrb.mxu0 %v1368_v26  ;;  %586 = vmatpush.msrb.mxu1 %v1370_v27 }
  0xee   :  { %495 = vmatpush.msra.mxu3 %v1427_v43 }
  0xef   :  { %567 = vmatpush.msrb.mxu0 %v1378_v29  ;;  %587 = vmatpush.msrb.mxu1 %v1380_v30 }
  0xf0   :  { %496 = vmatpush.msra.mxu3 %v1432_v45 }
  0xf1   :  { %568 = vmatpush.msrb.mxu0 %v1388_v32  ;;  %588 = vmatpush.msrb.mxu1 %v1390_v33 }
  0xf2   :  { %497 = vmatpush.msra.mxu3 %v1436_v46 }
  0xf3   :  { %569 = vmatpush.msrb.mxu0 %v1398_v35  ;;  %589 = vmatpush.msrb.mxu1 %v1841_v36 }
  0xf4   :  { %498 = vmatpush.msra.mxu3 %v1842_v38 }
  0xf5   :  { %570 = vmatpush.msrb.mxu0 %v1843_v39  ;;  %590 = vmatpush.msrb.mxu1 %v1844_v41  ;;  %v219_v39 = vld [vmem:[#allocation3 + $0x28] sm:$0xff] }
  0xf6   :  { %499 = vmatpush.msra.mxu3 %v1845_v47 }
  0xf7   :  { %571 = vmatpush.msrb.mxu0 %v1846_v48  ;;  %591 = vmatpush.msrb.mxu1 %v1847_v60 }
 0x154   :  { %v257_v55 = vpop.f32.mrf.mxu0 }
 0x155   :  { %v281_v56 = vadd.f32 %v257_v55, %v218_v62 }
 0x157   :  { %v1027_v57 = vmul.f32 -1.442695, %v281_v56 }
 0x159   :  { %1057 = vpow2.f32 %v1027_v57 }
 0x15a   :  { %v237_v63 = vpop.f32.mrf.mxu3 }
 0x15b   :  { %v280_v44 = vadd.f32 %v237_v63, %v217_v58  ;;  %v277_v58 = vpop.f32.mrf.mxu1 }
 0x15d   :  { %v1026_v49 = vmul.f32 -1.442695, %v280_v44 }
 0x15f   :  { %v1058_v50 = vpop.eup %1057  ;;  %1059 = vpow2.f32 %v1026_v49  ;;  %v320_v49 = vadd.f32 %v1561_v42, %v277_v58 }
 0x160   :  { %v289_v59 = vadd.f32 1.0, %v1058_v50 }
 0x162   :  { %1061 = vrcp.f32 %v289_v59  ;;  %vm310_vm13 = vweird.f32 %v289_v59 }
 0x165   :  { %v1060_v51 = vpop.eup %1059 }
 0x166   :  { %v288_v53 = vadd.f32 1.0, %v1060_v51 }
 0x168   :  { %1063 = vrcp.f32 %v288_v53  ;;  %v1062_v52 = vpop.eup %1061  ;;  %v301_v62 = vand.u32 2147483648, %v288_v53  ;;  %v299_v56 = vand.u32 2147483647, %v288_v53  ;;  %vm295_vm9 = vweird.f32 %v288_v53 }
 0x169   :  { %v306_v61 = vmul.f32 %v1062_v52, %v289_v59  ;;  %vm311_vm12 = vweird.f32 %v1062_v52 }
 0x16a   :  { %v302_v44 = vor.u32 1.1754944e-38, %v301_v62  ;;  %vm300_vm11 = vcmp.eq.f32.partialorder %v299_v56, 8.507059e+37  ;;  %vm312_vm14 = vmor %vm310_vm13, %vm311_vm12 }
 0x16b   :  { %v307_v47 = vsub.f32 1.0, %v306_v61  ;;  %v316_v61 = vand.u32 2147483648, %v289_v59 }
 0x16d   :  { %v308_v57 = vmul.f32 %v1062_v52, %v307_v47  ;;  %v317_v35 = vor.u32 1.1754944e-38, %v316_v61 }
 0x16e   :  { %v1064_v48 = vpop.eup %1063 }
 0x16f   :  { %v291_v60 = vmul.f32 %v1064_v48, %v288_v53  ;;  %vm296_vm8 = vweird.f32 %v1064_v48  ;;  %v309_v38 = vadd.f32 %v1062_v52, %v308_v57  ;;  %v1855_v57 = vld [vmem:[#allocation17_spill] sm:$0xff] }
 0x170   :  { %vm297_vm10 = vmor %vm295_vm9, %vm296_vm8 }
 0x171   :  { %v292_v41 = vsub.f32 1.0, %v291_v60  ;;  %v313_v47 = vsel %vm312_vm14, %v1062_v52, %v309_v38  ;;  %v1851_v38 = vld [vmem:[#allocation14_spill] sm:$0xff]  ;;  %v1854_v52 = vld [vmem:[#allocation16_spill] sm:$0xff] }
 0x173   :  { %v293_v55 = vmul.f32 %v1064_v48, %v292_v41  ;;  %v314_v41 = vand.u32 2147483647, %v289_v59  ;;  %v1853_v59 = vld [vmem:[#allocation19_spill] sm:$0xff] }
 0x175   :  { %v294_v63 = vadd.f32 %v1064_v48, %v293_v55  ;;  %vm315_vm15 = vcmp.eq.f32.partialorder %v314_v41, 8.507059e+37 }
 0x176   :  { %v318_v53 = vsel %vm315_vm15, %v317_v35, %v313_v47  ;;  %v1848_v35 = vld [vmem:[#allocation12_spill] sm:$0xff] }
 0x177   :  { %v298_v50 = vsel %vm297_vm10, %v1064_v48, %v294_v63  ;;  %v324_v62 = vsub.f32 1.0, %v318_v53  ;;  %v326_v48 = vmul.f32 %v318_v53, %v1564_v54  ;;  %v1849_v54 = vld [vmem:[#allocation13_spill] sm:$0xff] }
 0x178   :  { %v303_v51 = vsel %vm300_vm11, %v302_v44, %v298_v50  ;;  %v329_v63 = vld [vmem:[#allocation3 + $0x30] sm:$0xff]  ;;  %v330_v44 = vld [vmem:[#allocation3 + $0x38] sm:$0xff] }
 0x179   :  { %v321_v60 = vmul.f32 %v320_v49, %v303_v51 }
 0x17b   :  { %v322_v36 = vadd.f32 %v321_v60, %v219_v39  ;;  %v1852_v39 = vld [vmem:[#allocation15_spill] sm:$0xff] }
 0x17d   :  { %1065 = vtanh.f32 %v322_v36  ;;  %v1850_v36 = vld [vmem:[#allocation18_spill] sm:$0xff] }
 0x183   :  { %v1066_v55 = vpop.eup %1065 }
 0x184   :  { %v325_v58 = vmul.f32 %v1066_v55, %v324_v62 }
 0x186   :  { %v1619_v56 = vadd.f32 %v326_v48, %v325_v58 }
 0x188   :  { %348 = vmatmul.f32.vlgmr.msrb.gmra.mxu2 %v1619_v56  ;;  %368 = vmatmul.f32.vlgmr.msrb.gmra.mxu3 %v1619_v56 }
 0x189   :  { %388 = vmatmul.f32.vlgmr.msra.gmra.mxu0 %v1619_v56  ;;  %596 = vmatpush.msrb.mxu2 %v1321_v12 }
 0x18a   :  { %668 = vmatpush.msrb.mxu3 %v1286_v0  ;;  %688 = vmatpush.msra.mxu0 %v1288_v1 }
 0x18b   :  { %597 = vmatpush.msrb.mxu2 %v1326_v13 }
 0x18c   :  { %669 = vmatpush.msrb.mxu3 %v1290_v2  ;;  %689 = vmatpush.msra.mxu0 %v1294_v3 }
 0x18d   :  { %598 = vmatpush.msrb.mxu2 %v1336_v16 }
 0x18e   :  { %670 = vmatpush.msrb.mxu3 %v1296_v4  ;;  %690 = vmatpush.msra.mxu0 %v1298_v5 }
 0x18f   :  { %599 = vmatpush.msrb.mxu2 %v1346_v19 }
 0x190   :  { %671 = vmatpush.msrb.mxu3 %v1303_v6  ;;  %691 = vmatpush.msra.mxu0 %v1305_v7 }
 0x191   :  { %600 = vmatpush.msrb.mxu2 %v1356_v22 }
 0x192   :  { %672 = vmatpush.msrb.mxu3 %v1310_v8  ;;  %692 = vmatpush.msra.mxu0 %v1312_v9 }
 0x193   :  { %601 = vmatpush.msrb.mxu2 %v1366_v25 }
 0x194   :  { %673 = vmatpush.msrb.mxu3 %v1317_v10  ;;  %693 = vmatpush.msra.mxu0 %v1319_v11 }
 0x195   :  { %602 = vmatpush.msrb.mxu2 %v1376_v28 }
 0x196   :  { %674 = vmatpush.msrb.mxu3 %v1328_v14  ;;  %694 = vmatpush.msra.mxu0 %v1330_v15 }
 0x197   :  { %603 = vmatpush.msrb.mxu2 %v1386_v31 }
 0x198   :  { %675 = vmatpush.msrb.mxu3 %v1338_v17  ;;  %695 = vmatpush.msra.mxu0 %v1340_v18 }
 0x199   :  { %604 = vmatpush.msrb.mxu2 %v1396_v34 }
 0x19a   :  { %676 = vmatpush.msrb.mxu3 %v1348_v20  ;;  %696 = vmatpush.msra.mxu0 %v1350_v21 }
 0x19b   :  { %605 = vmatpush.msrb.mxu2 %v1406_v37 }
 0x19c   :  { %677 = vmatpush.msrb.mxu3 %v1358_v23  ;;  %697 = vmatpush.msra.mxu0 %v1360_v24 }
 0x19d   :  { %606 = vmatpush.msrb.mxu2 %v1416_v40 }
 0x19e   :  { %678 = vmatpush.msrb.mxu3 %v1368_v26  ;;  %698 = vmatpush.msra.mxu0 %v1370_v27 }
 0x19f   :  { %607 = vmatpush.msrb.mxu2 %v1427_v43 }
 0x1a0   :  { %679 = vmatpush.msrb.mxu3 %v1378_v29  ;;  %699 = vmatpush.msra.mxu0 %v1380_v30 }
 0x1a1   :  { %608 = vmatpush.msrb.mxu2 %v1432_v45 }
 0x1a2   :  { %680 = vmatpush.msrb.mxu3 %v1388_v32  ;;  %700 = vmatpush.msra.mxu0 %v1390_v33 }
 0x1a3   :  { %609 = vmatpush.msrb.mxu2 %v1436_v46 }
 0x1a4   :  { %681 = vmatpush.msrb.mxu3 %v1848_v35  ;;  %701 = vmatpush.msra.mxu0 %v1849_v54 }
 0x1a5   :  { %610 = vmatpush.msrb.mxu2 %v1850_v36 }
 0x1a6   :  { %682 = vmatpush.msrb.mxu3 %v1851_v38  ;;  %702 = vmatpush.msra.mxu0 %v1852_v39 }
 0x1a7   :  { %611 = vmatpush.msrb.mxu2 %v1853_v59 }
 0x1a8   :  { %683 = vmatpush.msrb.mxu3 %v1854_v52  ;;  %703 = vmatpush.msra.mxu0 %v1855_v57 }
 0x20b   :  { %v349_v49 = vpop.f32.mrf.mxu2  ;;  %v369_v50 = vpop.f32.mrf.mxu3 }
 0x20c   :  { %v392_v51 = vadd.f32 %v349_v49, %v329_v63  ;;  %v393_v61 = vadd.f32 %v369_v50, %v330_v44  ;;  %v389_v44 = vpop.f32.mrf.mxu0 }
 0x20e   :  { %v1028_v60 = vmul.f32 -1.442695, %v392_v51  ;;  %v1029_v41 = vmul.f32 -1.442695, %v393_v61  ;;  %v432_v61 = vadd.f32 %v1561_v42, %v389_v44 }
 0x210   :  { %1067 = vpow2.f32 %v1028_v60 }
 0x211   :  { %1069 = vpow2.f32 %v1029_v41 }
 0x216   :  { %v1068_v47 = vpop.eup %1067 }
 0x217   :  { %v1070_v53 = vpop.eup %1069  ;;  %v400_v62 = vadd.f32 1.0, %v1068_v47  ;;  %v331_v47 = vld [vmem:[#allocation3 + $0x40] sm:$0xff] }
 0x218   :  { %v401_v55 = vadd.f32 1.0, %v1070_v53 }
 0x219   :  { %1071 = vrcp.f32 %v400_v62  ;;  %v413_v39 = vand.u32 2147483648, %v400_v62  ;;  %v411_v63 = vand.u32 2147483647, %v400_v62  ;;  %vm407_vm1 = vweird.f32 %v400_v62 }
 0x21a   :  { %1073 = vrcp.f32 %v401_v55  ;;  %vm422_vm5 = vweird.f32 %v401_v55 }
 0x21b   :  { %v414_v51 = vor.u32 1.1754944e-38, %v413_v39  ;;  %vm412_vm3 = vcmp.eq.f32.partialorder %v411_v63, 8.507059e+37 }
 0x21f   :  { %v1072_v58 = vpop.eup %1071 }
 0x220   :  { %v1074_v48 = vpop.eup %1073  ;;  %v403_v52 = vmul.f32 %v1072_v58, %v400_v62  ;;  %vm408_vm0 = vweird.f32 %v1072_v58 }
 0x221   :  { %v418_v57 = vmul.f32 %v1074_v48, %v401_v55  ;;  %vm409_vm2 = vmor %vm407_vm1, %vm408_vm0  ;;  %vm423_vm4 = vweird.f32 %v1074_v48 }
 0x222   :  { %v404_v59 = vsub.f32 1.0, %v403_v52  ;;  %v428_v52 = vand.u32 2147483648, %v401_v55  ;;  %vm424_vm6 = vmor %vm422_vm5, %vm423_vm4 }
 0x223   :  { %v419_v38 = vsub.f32 1.0, %v418_v57 }
 0x224   :  { %v405_v36 = vmul.f32 %v1072_v58, %v404_v59  ;;  %v426_v59 = vand.u32 2147483647, %v401_v55 }
 0x225   :  { %v420_v49 = vmul.f32 %v1074_v48, %v419_v38  ;;  %v429_v38 = vor.u32 1.1754944e-38, %v428_v52  ;;  %v1737_v52 = vld [vmem:[#allocation6 + $0x160] sm:$0xff] }
 0x226   :  { %v406_v50 = vadd.f32 %v1072_v58, %v405_v36  ;;  %vm427_vm7 = vcmp.eq.f32.partialorder %v426_v59, 8.507059e+37  ;;  %v1131_v59 = vld [vmem:[#allocation6 + $0x150] sm:$0xff] }
 0x227   :  { %v421_v53 = vadd.f32 %v1074_v48, %v420_v49 }
 0x228   :  { %v410_v60 = vsel %vm409_vm2, %v1072_v58, %v406_v50 }
 0x229   :  { %v415_v41 = vsel %vm412_vm3, %v414_v51, %v410_v60  ;;  %v425_v35 = vsel %vm424_vm6, %v1074_v48, %v421_v53  ;;  %v1129_v53 = vld [vmem:[#allocation6 + $0x170] sm:$0xff] }
 0x22a   :  { %v433_v54 = vmul.f32 %v432_v61, %v415_v41  ;;  %v430_v36 = vsel %vm427_vm7, %v429_v38, %v425_v35  ;;  %v1734_v41 = vld [vmem:[#allocation6 + $0x178] sm:$0xff]  ;;  %v1740_v38 = vld [vmem:[#allocation6 + $0x148] sm:$0xff] }
 0x22b   :  { %v436_v39 = vsub.f32 1.0, %v430_v36  ;;  %v438_v58 = vmul.f32 %v430_v36, %v1619_v56  ;;  %v1134_v36 = vld [vmem:[#allocation6 + $0x138] sm:$0xff] }
 0x22c   :  { %v434_v57 = vadd.f32 %v433_v54, %v331_v47  ;;  %v1128_v47 = vld [vmem:[#allocation6 + $0x168] sm:$0xff] }
 0x22e   :  { %1075 = vtanh.f32 %v434_v57  ;;  %v1132_v57 = vld [vmem:[#allocation6 + $0x158] sm:$0xff] }
 0x234   :  { %v1076_v62 = vpop.eup %1075 }
 0x235   :  { %v437_v44 = vmul.f32 %v1076_v62, %v436_v39  ;;  %v1135_v39 = vld [vmem:[#allocation6 + $0x140] sm:$0xff]  ;;  %v1743_v62 = vld [vmem:[#allocation6 + $0x130] sm:$0xff] }
 0x237   :  { %v1674_v63 = vadd.f32 %v438_v58, %v437_v44  ;;  %v1137_v44 = vld [vmem:[#allocation6 + $0x120] sm:$0xff]  ;;  %v1138_v58 = vld [vmem:[#allocation6 + $0x128] sm:$0xff] }
 0x239   :  { %460 = vmatmul.f32.vlgmr.msra.gmra.mxu1 %v1674_v63  ;;  %480 = vmatmul.f32.vlgmr.msra.gmra.mxu2 %v1674_v63 }
 0x23a   :  { %500 = vmatmul.f32.vlgmr.msra.gmra.mxu3 %v1674_v63  ;;  %708 = vmatpush.msra.mxu1 %v1321_v12  ;;  %v442_v12 = vld [vmem:[#allocation3 + $0x50] sm:$0xff] }
 0x23b   :  { %780 = vmatpush.msra.mxu2 %v1286_v0  ;;  %800 = vmatpush.msra.mxu3 %v1288_v1  ;;  %v1856_v0 = vld [vmem:[#allocation12_spill] sm:$0xff]  ;;  %v1857_v1 = vld [vmem:[#allocation13_spill] sm:$0xff] }
 0x23c   :  { %709 = vmatpush.msra.mxu1 %v1326_v13 }
 0x23d   :  { %781 = vmatpush.msra.mxu2 %v1290_v2  ;;  %801 = vmatpush.msra.mxu3 %v1294_v3  ;;  %v1858_v2 = vld [vmem:[#allocation18_spill] sm:$0xff] }
 0x23e   :  { %710 = vmatpush.msra.mxu1 %v1336_v16  ;;  %v1859_v3 = vld [vmem:[#allocation14_spill] sm:$0xff] }
 0x23f   :  { %782 = vmatpush.msra.mxu2 %v1296_v4  ;;  %802 = vmatpush.msra.mxu3 %v1298_v5  ;;  %v1860_v4 = vld [vmem:[#allocation15_spill] sm:$0xff] }
 0x240   :  { %711 = vmatpush.msra.mxu1 %v1346_v19  ;;  %v1861_v5 = vld [vmem:[#allocation19_spill] sm:$0xff] }
 0x241   :  { %783 = vmatpush.msra.mxu2 %v1303_v6  ;;  %803 = vmatpush.msra.mxu3 %v1305_v7  ;;  %v1862_v6 = vld [vmem:[#allocation16_spill] sm:$0xff]  ;;  %v1863_v7 = vld [vmem:[#allocation17_spill] sm:$0xff] }
 0x242   :  { %712 = vmatpush.msra.mxu1 %v1356_v22 }
 0x243   :  { %784 = vmatpush.msra.mxu2 %v1310_v8  ;;  %804 = vmatpush.msra.mxu3 %v1312_v9  ;;  %v441_v8 = vld [vmem:[#allocation3 + $0x48] sm:$0xff] }
 0x244   :  { %713 = vmatpush.msra.mxu1 %v1366_v25 }
 0x245   :  { %785 = vmatpush.msra.mxu2 %v1317_v10  ;;  %805 = vmatpush.msra.mxu3 %v1319_v11 }
 0x246   :  { %714 = vmatpush.msra.mxu1 %v1376_v28 }
 0x247   :  { %786 = vmatpush.msra.mxu2 %v1328_v14  ;;  %806 = vmatpush.msra.mxu3 %v1330_v15 }
 0x248   :  { %715 = vmatpush.msra.mxu1 %v1386_v31 }
 0x249   :  { %787 = vmatpush.msra.mxu2 %v1338_v17  ;;  %807 = vmatpush.msra.mxu3 %v1340_v18 }
 0x24a   :  { %716 = vmatpush.msra.mxu1 %v1396_v34  ;;  %v443_v34 = vld [vmem:[#allocation3 + $0x58] sm:$0xff] }
 0x24b   :  { %788 = vmatpush.msra.mxu2 %v1348_v20  ;;  %808 = vmatpush.msra.mxu3 %v1350_v21 }
 0x24c   :  { %717 = vmatpush.msra.mxu1 %v1406_v37 }
 0x24d   :  { %789 = vmatpush.msra.mxu2 %v1358_v23  ;;  %809 = vmatpush.msra.mxu3 %v1360_v24 }
 0x24e   :  { %718 = vmatpush.msra.mxu1 %v1416_v40 }
 0x24f   :  { %790 = vmatpush.msra.mxu2 %v1368_v26  ;;  %810 = vmatpush.msra.mxu3 %v1370_v27 }
 0x250   :  { %719 = vmatpush.msra.mxu1 %v1427_v43 }
 0x251   :  { %791 = vmatpush.msra.mxu2 %v1378_v29  ;;  %811 = vmatpush.msra.mxu3 %v1380_v30 }
 0x252   :  { %720 = vmatpush.msra.mxu1 %v1432_v45 }
 0x253   :  { %792 = vmatpush.msra.mxu2 %v1388_v32  ;;  %812 = vmatpush.msra.mxu3 %v1390_v33 }
 0x254   :  { %721 = vmatpush.msra.mxu1 %v1436_v46 }
 0x255   :  { %793 = vmatpush.msra.mxu2 %v1856_v0  ;;  %813 = vmatpush.msra.mxu3 %v1857_v1  ;;  %v1140_v0 = vld [vmem:[#allocation6 + $0x108] sm:$0xff]  ;;  %v1141_v1 = vld [vmem:[#allocation6 + $0x110] sm:$0xff] }
 0x256   :  { %722 = vmatpush.msra.mxu1 %v1858_v2  ;;  %v1749_v2 = vld [vmem:[#allocation6 + $0x100] sm:$0xff] }
 0x257   :  { %794 = vmatpush.msra.mxu2 %v1859_v3  ;;  %814 = vmatpush.msra.mxu3 %v1860_v4  ;;  %v1143_v3 = vld [vmem:[#allocation6 + $0xf0] sm:$0xff]  ;;  %v1144_v4 = vld [vmem:[#allocation6 + $0xf8] sm:$0xff] }
 0x258   :  { %723 = vmatpush.msra.mxu1 %v1861_v5  ;;  %v1752_v5 = vld [vmem:[#allocation6 + $0xe8] sm:$0xff] }
 0x259   :  { %795 = vmatpush.msra.mxu2 %v1862_v6  ;;  %815 = vmatpush.msra.mxu3 %v1863_v7  ;;  %v1146_v6 = vld [vmem:[#allocation6 + $0xd8] sm:$0xff]  ;;  %v1147_v7 = vld [vmem:[#allocation6 + $0xe0] sm:$0xff] }
 0x2b6   :  { %v461_v9 = vpop.f32.mrf.mxu1 }
 0x2b7   :  { %v504_v10 = vadd.f32 %v461_v9, %v441_v8  ;;  %v1755_v8 = vld [vmem:[#allocation6 + $0xd0] sm:$0xff]  ;;  %v1149_v9 = vld [vmem:[#allocation6 + $0xc0] sm:$0xff] }
 0x2b9   :  { %v1030_v11 = vmul.f32 -1.442695, %v504_v10  ;;  %v1150_v10 = vld [vmem:[#allocation6 + $0xc8] sm:$0xff] }
 0x2bb   :  { %1077 = vpow2.f32 %v1030_v11  ;;  %v1758_v11 = vld [vmem:[#allocation6 + $0xb8] sm:$0xff] }
 0x2bc   :  { %v481_v13 = vpop.f32.mrf.mxu2 }
 0x2bd   :  { %v505_v14 = vadd.f32 %v481_v13, %v442_v12  ;;  %v501_v27 = vpop.f32.mrf.mxu3  ;;  %v1152_v12 = vld [vmem:[#allocation6 + $0xa8] sm:$0xff]  ;;  %v1153_v13 = vld [vmem:[#allocation6 + $0xb0] sm:$0xff] }
 0x2be   :  { %v544_v33 = vadd.f32 %v1561_v42, %v501_v27  ;;  %v1167_v27 = vld [vmem:[#allocation6 + $0x30] sm:$0xff] }
 0x2bf   :  { %v1031_v15 = vmul.f32 -1.442695, %v505_v14  ;;  %v1761_v14 = vld [vmem:[#allocation6 + $0xa0] sm:$0xff] }
 0x2c1   :  { %v1078_v16 = vpop.eup %1077  ;;  %1079 = vpow2.f32 %v1031_v15  ;;  %v1155_v15 = vld [vmem:[#allocation6 + $0x90] sm:$0xff] }
 0x2c2   :  { %v512_v17 = vadd.f32 1.0, %v1078_v16  ;;  %v1156_v16 = vld [vmem:[#allocation6 + $0x98] sm:$0xff] }
 0x2c4   :  { %1081 = vrcp.f32 %v512_v17  ;;  %v525_v23 = vand.u32 2147483648, %v512_v17  ;;  %v523_v25 = vand.u32 2147483647, %v512_v17  ;;  %vm519_vm9 = vweird.f32 %v512_v17 }
 0x2c6   :  { %v526_v30 = vor.u32 1.1754944e-38, %v525_v23  ;;  %vm524_vm11 = vcmp.eq.f32.partialorder %v523_v25, 8.507059e+37  ;;  %v1770_v23 = vld [vmem:[#allocation6 + $0x58] sm:$0xff]  ;;  %v1165_v25 = vld [vmem:[#allocation6 + $0x50] sm:$0xff] }
 0x2c7   :  { %v1080_v18 = vpop.eup %1079 }
 0x2c8   :  { %v513_v19 = vadd.f32 1.0, %v1080_v18  ;;  %v1158_v18 = vld [vmem:[#allocation6 + $0x78] sm:$0xff] }
 0x2ca   :  { %v1082_v20 = vpop.eup %1081  ;;  %1083 = vrcp.f32 %v513_v19  ;;  %v540_v45 = vand.u32 2147483648, %v513_v19  ;;  %v538_v46 = vand.u32 2147483647, %v513_v19  ;;  %vm534_vm13 = vweird.f32 %v513_v19 }
 0x2cb   :  { %v515_v21 = vmul.f32 %v1082_v20, %v512_v17  ;;  %vm520_vm8 = vweird.f32 %v1082_v20  ;;  %v1764_v17 = vld [vmem:[#allocation6 + $0x88] sm:$0xff] }
 0x2cc   :  { %vm521_vm10 = vmor %vm519_vm9, %vm520_vm8  ;;  %v541_v55 = vor.u32 1.1754944e-38, %v540_v45  ;;  %vm539_vm15 = vcmp.eq.f32.partialorder %v538_v46, 8.507059e+37 }
 0x2cd   :  { %v516_v22 = vsub.f32 1.0, %v515_v21  ;;  %v1161_v21 = vld [vmem:[#allocation6 + $0x60] sm:$0xff] }
 0x2cf   :  { %v517_v24 = vmul.f32 %v1082_v20, %v516_v22  ;;  %v1162_v22 = vld [vmem:[#allocation6 + $0x68] sm:$0xff] }
 0x2d0   :  { %v1084_v26 = vpop.eup %1083 }
 0x2d1   :  { %v530_v28 = vmul.f32 %v1084_v26, %v513_v19  ;;  %v518_v29 = vadd.f32 %v1082_v20, %v517_v24  ;;  %vm535_vm12 = vweird.f32 %v1084_v26  ;;  %v1159_v19 = vld [vmem:[#allocation6 + $0x80] sm:$0xff]  ;;  %v1164_v24 = vld [vmem:[#allocation6 + $0x48] sm:$0xff] }
 0x2d2   :  { %vm536_vm14 = vmor %vm534_vm13, %vm535_vm12 }
 0x2d3   :  { %v531_v31 = vsub.f32 1.0, %v530_v28  ;;  %v522_v32 = vsel %vm521_vm10, %v1082_v20, %v518_v29  ;;  %v1767_v20 = vld [vmem:[#allocation6 + $0x70] sm:$0xff]  ;;  %v1168_v28 = vld [vmem:[#allocation6 + $0x38] sm:$0xff]  ;;  %v1776_v29 = vld [vmem:[#allocation6 + $0x28] sm:$0xff] }
 0x2d4   :  { %v527_v37 = vsel %vm524_vm11, %v526_v30, %v522_v32  ;;  %v1170_v30 = vld [vmem:[#allocation6 + $0x18] sm:$0xff]  ;;  %v1779_v32 = vld [vmem:[#allocation6 + $0x10] sm:$0xff] }
 0x2d5   :  { %v532_v40 = vmul.f32 %v1084_v26, %v531_v31  ;;  %v545_v43 = vmul.f32 %v544_v33, %v527_v37  ;;  %v1171_v31 = vld [vmem:[#allocation6 + $0x20] sm:$0xff] }
 0x2d6   :  { %v1173_v33 = vld [vmem:[#allocation6] sm:$0xff] }
 0x2d7   :  { %v546_v56 = vadd.f32 %v545_v43, %v443_v34  ;;  %v533_v35 = vadd.f32 %v1084_v26, %v532_v40  ;;  %v1174_v34 = vld [vmem:[#allocation6 + $0x8] sm:$0xff]  ;;  %v553_v37 = vld [vmem:[#allocation3 + $0x60] sm:$0xff] }
 0x2d8   :  { %v554_v40 = vld [vmem:[#allocation3 + $0x68] sm:$0xff] }
 0x2d9   :  { %1085 = vtanh.f32 %v546_v56  ;;  %v537_v54 = vsel %vm536_vm14, %v1084_v26, %v533_v35  ;;  %v1773_v26 = vld [vmem:[#allocation6 + $0x40] sm:$0xff] }
 0x2da   :  { %v542_v48 = vsel %vm539_vm15, %v541_v55, %v537_v54 }
 0x2db   :  { %v548_v49 = vsub.f32 1.0, %v542_v48  ;;  %v550_v61 = vmul.f32 %v542_v48, %v1674_v63  ;;  %v1746_v63 = vld [vmem:[#allocation6 + $0x118] sm:$0xff] }
 0x2df   :  { %v1086_v50 = vpop.eup %1085 }
 0x2e0   :  { %v549_v51 = vmul.f32 %v1086_v50, %v548_v49 }
 0x2e2   :  { %v1729_v60 = vadd.f32 %v550_v61, %v549_v51 }
 0x2e4   :  { %572 = vmatmul.f32.vlgmr.msrb.gmra.mxu0 %v1729_v60  ;;  %592 = vmatmul.f32.vlgmr.msrb.gmra.mxu1 %v1729_v60 }
 0x2e5   :  { %612 = vmatmul.f32.vlgmr.msrb.gmra.mxu2 %v1729_v60  ;;  %820 = vmatpush.msrb.mxu0 %v1734_v41 }
 0x2e6   :  { %892 = vmatpush.msrb.mxu1 %v1128_v47  ;;  %912 = vmatpush.msrb.mxu2 %v1129_v53 }
 0x2e7   :  { %821 = vmatpush.msrb.mxu0 %v1737_v52 }
 0x2e8   :  { %893 = vmatpush.msrb.mxu1 %v1131_v59  ;;  %913 = vmatpush.msrb.mxu2 %v1132_v57 }
 0x2e9   :  { %822 = vmatpush.msrb.mxu0 %v1740_v38 }
 0x2ea   :  { %894 = vmatpush.msrb.mxu1 %v1134_v36  ;;  %914 = vmatpush.msrb.mxu2 %v1135_v39 }
 0x2eb   :  { %823 = vmatpush.msrb.mxu0 %v1743_v62 }
 0x2ec   :  { %895 = vmatpush.msrb.mxu1 %v1137_v44  ;;  %915 = vmatpush.msrb.mxu2 %v1138_v58 }
 0x2ed   :  { %824 = vmatpush.msrb.mxu0 %v1746_v63 }
 0x2ee   :  { %896 = vmatpush.msrb.mxu1 %v1140_v0  ;;  %916 = vmatpush.msrb.mxu2 %v1141_v1 }
 0x2ef   :  { %825 = vmatpush.msrb.mxu0 %v1749_v2 }
 0x2f0   :  { %897 = vmatpush.msrb.mxu1 %v1143_v3  ;;  %917 = vmatpush.msrb.mxu2 %v1144_v4 }
 0x2f1   :  { %826 = vmatpush.msrb.mxu0 %v1752_v5 }
 0x2f2   :  { %898 = vmatpush.msrb.mxu1 %v1146_v6  ;;  %918 = vmatpush.msrb.mxu2 %v1147_v7  ;;  %v555_v7 = vld [vmem:[#allocation3 + $0x70] sm:$0xff] }
 0x2f3   :  { %827 = vmatpush.msrb.mxu0 %v1755_v8 }
 0x2f4   :  { %899 = vmatpush.msrb.mxu1 %v1149_v9  ;;  %919 = vmatpush.msrb.mxu2 %v1150_v10 }
 0x2f5   :  { %828 = vmatpush.msrb.mxu0 %v1758_v11 }
 0x2f6   :  { %900 = vmatpush.msrb.mxu1 %v1152_v12  ;;  %920 = vmatpush.msrb.mxu2 %v1153_v13 }
 0x2f7   :  { %829 = vmatpush.msrb.mxu0 %v1761_v14 }
 0x2f8   :  { %901 = vmatpush.msrb.mxu1 %v1155_v15  ;;  %921 = vmatpush.msrb.mxu2 %v1156_v16 }
 0x2f9   :  { %830 = vmatpush.msrb.mxu0 %v1764_v17 }
 0x2fa   :  { %902 = vmatpush.msrb.mxu1 %v1158_v18  ;;  %922 = vmatpush.msrb.mxu2 %v1159_v19 }
 0x2fb   :  { %831 = vmatpush.msrb.mxu0 %v1767_v20 }
 0x2fc   :  { %903 = vmatpush.msrb.mxu1 %v1161_v21  ;;  %923 = vmatpush.msrb.mxu2 %v1162_v22 }
 0x2fd   :  { %832 = vmatpush.msrb.mxu0 %v1770_v23 }
 0x2fe   :  { %904 = vmatpush.msrb.mxu1 %v1164_v24  ;;  %924 = vmatpush.msrb.mxu2 %v1165_v25 }
 0x2ff   :  { %833 = vmatpush.msrb.mxu0 %v1773_v26 }
 0x300   :  { %905 = vmatpush.msrb.mxu1 %v1167_v27  ;;  %925 = vmatpush.msrb.mxu2 %v1168_v28 }
 0x301   :  { %834 = vmatpush.msrb.mxu0 %v1776_v29 }
 0x302   :  { %906 = vmatpush.msrb.mxu1 %v1170_v30  ;;  %926 = vmatpush.msrb.mxu2 %v1171_v31 }
 0x303   :  { %835 = vmatpush.msrb.mxu0 %v1779_v32 }
 0x304   :  { %907 = vmatpush.msrb.mxu1 %v1173_v33  ;;  %927 = vmatpush.msrb.mxu2 %v1174_v34 }
 0x361   :  { %v573_v43 = vpop.f32.mrf.mxu0  ;;  %v593_v45 = vpop.f32.mrf.mxu1 }
 0x362   :  { %v616_v46 = vadd.f32 %v573_v43, %v553_v37  ;;  %v617_v56 = vadd.f32 %v593_v45, %v554_v40 }
 0x364   :  { %v1032_v35 = vmul.f32 -1.442695, %v616_v46  ;;  %v1033_v54 = vmul.f32 -1.442695, %v617_v56 }
 0x366   :  { %1087 = vpow2.f32 %v1032_v35 }
 0x367   :  { %1089 = vpow2.f32 %v1033_v54  ;;  %v667_v54 = vld [vmem:[#allocation3 + $0x88] sm:$0xff] }
 0x368   :  { %v613_v0 = vpop.f32.mrf.mxu2 }
 0x369   :  { %v656_v6 = vadd.f32 %v1561_v42, %v613_v0 }
 0x36c   :  { %v1088_v55 = vpop.eup %1087 }
 0x36d   :  { %v1090_v48 = vpop.eup %1089  ;;  %v624_v49 = vadd.f32 1.0, %v1088_v55 }
 0x36e   :  { %v625_v50 = vadd.f32 1.0, %v1090_v48 }
 0x36f   :  { %1091 = vrcp.f32 %v624_v49  ;;  %v637_v36 = vand.u32 2147483648, %v624_v49  ;;  %v635_v44 = vand.u32 2147483647, %v624_v49  ;;  %vm631_vm1 = vweird.f32 %v624_v49 }
 0x370   :  { %1093 = vrcp.f32 %v625_v50  ;;  %v652_v13 = vand.u32 2147483648, %v625_v50  ;;  %vm646_vm5 = vweird.f32 %v625_v50  ;;  %v650_v15 = vand.u32 2147483647, %v625_v50 }
 0x371   :  { %v638_v3 = vor.u32 1.1754944e-38, %v637_v36  ;;  %vm636_vm3 = vcmp.eq.f32.partialorder %v635_v44, 8.507059e+37  ;;  %v777_v44 = vld [vmem:[#allocation3 + $0x90] sm:$0xff] }
 0x372   :  { %v653_v19 = vor.u32 1.1754944e-38, %v652_v13  ;;  %vm651_vm7 = vcmp.eq.f32.partialorder %v650_v15, 8.507059e+37 }
 0x375   :  { %v1092_v51 = vpop.eup %1091 }
 0x376   :  { %v1094_v61 = vpop.eup %1093  ;;  %v627_v47 = vmul.f32 %v1092_v51, %v624_v49  ;;  %vm632_vm0 = vweird.f32 %v1092_v51 }
 0x377   :  { %v642_v53 = vmul.f32 %v1094_v61, %v625_v50  ;;  %vm633_vm2 = vmor %vm631_vm1, %vm632_vm0  ;;  %vm647_vm4 = vweird.f32 %v1094_v61 }
 0x378   :  { %v628_v59 = vsub.f32 1.0, %v627_v47  ;;  %vm648_vm6 = vmor %vm646_vm5, %vm647_vm4 }
 0x379   :  { %v643_v57 = vsub.f32 1.0, %v642_v53 }
 0x37a   :  { %v629_v39 = vmul.f32 %v1092_v51, %v628_v59 }
 0x37b   :  { %v644_v58 = vmul.f32 %v1094_v61, %v643_v57 }
 0x37c   :  { %v630_v1 = vadd.f32 %v1092_v51, %v629_v39 }
 0x37d   :  { %v645_v10 = vadd.f32 %v1094_v61, %v644_v58  ;;  %v778_v58 = vld [vmem:[#allocation3 + $0x98] sm:$0xff] }
 0x37e   :  { %v634_v4 = vsel %vm633_vm2, %v1092_v51, %v630_v1 }
 0x37f   :  { %v639_v9 = vsel %vm636_vm3, %v638_v3, %v634_v4  ;;  %v649_v18 = vsel %vm648_vm6, %v1094_v61, %v645_v10 }
 0x380   :  { %v657_v12 = vmul.f32 %v656_v6, %v639_v9  ;;  %v654_v21 = vsel %vm651_vm7, %v653_v19, %v649_v18 }
 0x381   :  { %v660_v22 = vsub.f32 1.0, %v654_v21  ;;  %v662_v27 = vmul.f32 %v654_v21, %v1729_v60  ;;  %v666_v60 = vld [vmem:[#allocation3 + $0x80] sm:$0xff] }
 0x382   :  { %v658_v16 = vadd.f32 %v657_v12, %v555_v7 }
 0x384   :  { %1095 = vtanh.f32 %v658_v16 }
 0x38a   :  { %v1096_v24 = vpop.eup %1095 }
 0x38b   :  { %v661_v25 = vmul.f32 %v1096_v24, %v660_v22 }
 0x38d   :  { %v1784_v28 = vadd.f32 %v662_v27, %v661_v25 }
 0x38f   :  { %684 = vmatmul.f32.vlgmr.msrb.gmra.mxu3 %v1784_v28  ;;  %704 = vmatmul.f32.vlgmr.msra.gmra.mxu0 %v1784_v28 }
 0x390   :  { %724 = vmatmul.f32.vlgmr.msra.gmra.mxu1 %v1784_v28  ;;  %932 = vmatpush.msrb.mxu3 %v1734_v41 }
 0x392   :  { %933 = vmatpush.msrb.mxu3 %v1737_v52 }
 0x394   :  { %934 = vmatpush.msrb.mxu3 %v1740_v38 }
 0x396   :  { %935 = vmatpush.msrb.mxu3 %v1743_v62  ;;  %v665_v62 = vld [vmem:[#allocation3 + $0x78] sm:$0xff] }
 0x398   :  { %936 = vmatpush.msrb.mxu3 %v1746_v63 }
 0x39a   :  { %937 = vmatpush.msrb.mxu3 %v1749_v2 }
 0x39c   :  { %938 = vmatpush.msrb.mxu3 %v1752_v5 }
 0x39e   :  { %939 = vmatpush.msrb.mxu3 %v1755_v8 }
 0x3a0   :  { %940 = vmatpush.msrb.mxu3 %v1758_v11 }
 0x3a2   :  { %941 = vmatpush.msrb.mxu3 %v1761_v14 }
 0x3a4   :  { %942 = vmatpush.msrb.mxu3 %v1764_v17 }
 0x3a6   :  { %943 = vmatpush.msrb.mxu3 %v1767_v20 }
 0x3a8   :  { %944 = vmatpush.msrb.mxu3 %v1770_v23 }
 0x3aa   :  { %945 = vmatpush.msrb.mxu3 %v1773_v26 }
 0x3ac   :  { %946 = vmatpush.msrb.mxu3 %v1776_v29 }
 0x3ae   :  { %947 = vmatpush.msrb.mxu3 %v1779_v32 }
 0x40c   :  { %v705_v41 = vpop.f32.mrf.mxu0 }
 0x40d   :  { %v729_v52 = vadd.f32 %v705_v41, %v666_v60  ;;  %v725_v40 = vpop.f32.mrf.mxu1 }
 0x40e   :  { %v768_v46 = vadd.f32 %v1561_v42, %v725_v40 }
 0x40f   :  { %v1035_v38 = vmul.f32 -1.442695, %v729_v52 }
 0x411   :  { %1097 = vpow2.f32 %v1035_v38  ;;  %v1175_v38 = vld [vmem:[%s1815_s2] ss:$0 sm:$0xff]  ;;  %s1259_s2 = smov [#allocation8]  }
 0x412   :  { %v685_v63 = vpop.f32.mrf.mxu3  ;;  %s1011_s26 = sshll.u32 %s1259_s2, 4  ;;  %s1012_s26 = int_to_ptr.vmem [resolvable:$true] %s1011_s26 }
 0x413   :  { %v728_v2 = vadd.f32 %v685_v63, %v665_v62 }
 0x415   :  { %v1034_v5 = vmul.f32 -1.442695, %v728_v2 }
 0x417   :  { %v1098_v8 = vpop.eup %1097  ;;  %1099 = vpow2.f32 %v1034_v5  ;;  %v779_v5 = vld [vmem:[#allocation3 + $0xa0] sm:$0xff] }
 0x418   :  { %v737_v11 = vadd.f32 1.0, %v1098_v8 }
 0x41a   :  { %1101 = vrcp.f32 %v737_v11  ;;  %v764_v48 = vand.u32 2147483648, %v737_v11  ;;  %vm758_vm13 = vweird.f32 %v737_v11  ;;  %v762_v50 = vand.u32 2147483647, %v737_v11 }
 0x41c   :  { %v765_v47 = vor.u32 1.1754944e-38, %v764_v48  ;;  %vm763_vm15 = vcmp.eq.f32.partialorder %v762_v50, 8.507059e+37 }
 0x41d   :  { %v1100_v14 = vpop.eup %1099 }
 0x41e   :  { %v736_v17 = vadd.f32 1.0, %v1100_v14 }
 0x420   :  { %1103 = vrcp.f32 %v736_v17  ;;  %v1102_v20 = vpop.eup %1101  ;;  %v749_v32 = vand.u32 2147483648, %v736_v17  ;;  %v747_v34 = vand.u32 2147483647, %v736_v17  ;;  %vm743_vm9 = vweird.f32 %v736_v17 }
 0x421   :  { %v754_v23 = vmul.f32 %v1102_v20, %v737_v11  ;;  %vm759_vm12 = vweird.f32 %v1102_v20 }
 0x422   :  { %v750_v45 = vor.u32 1.1754944e-38, %v749_v32  ;;  %vm748_vm11 = vcmp.eq.f32.partialorder %v747_v34, 8.507059e+37  ;;  %vm760_vm14 = vmor %vm758_vm13, %vm759_vm12 }
 0x423   :  { %v755_v30 = vsub.f32 1.0, %v754_v23 }
 0x425   :  { %v756_v37 = vmul.f32 %v1102_v20, %v755_v30 }
 0x426   :  { %v1104_v26 = vpop.eup %1103 }
 0x427   :  { %v739_v29 = vmul.f32 %v1104_v26, %v736_v17  ;;  %vm744_vm8 = vweird.f32 %v1104_v26  ;;  %v757_v55 = vadd.f32 %v1102_v20, %v756_v37  ;;  %v889_v37 = vld [vmem:[#allocation3 + $0xa8] sm:$0xff] }
 0x428   :  { %vm745_vm10 = vmor %vm743_vm9, %vm744_vm8 }
 0x429   :  { %v740_v31 = vsub.f32 1.0, %v739_v29  ;;  %v761_v61 = vsel %vm760_vm14, %v1102_v20, %v757_v55 }
 0x42a   :  { %v766_v53 = vsel %vm763_vm15, %v765_v47, %v761_v61 }
 0x42b   :  { %v741_v33 = vmul.f32 %v1104_v26, %v740_v31  ;;  %v772_v59 = vsub.f32 1.0, %v766_v53  ;;  %v774_v36 = vmul.f32 %v766_v53, %v1784_v28 }
 0x42d   :  { %v742_v43 = vadd.f32 %v1104_v26, %v741_v33 }
 0x42f   :  { %v746_v56 = vsel %vm745_vm10, %v1104_v26, %v742_v43 }
 0x430   :  { %v751_v35 = vsel %vm748_vm11, %v750_v45, %v746_v56 }
 0x431   :  { %v769_v49 = vmul.f32 %v768_v46, %v751_v35  ;;  %v890_v46 = vld [vmem:[#allocation3 + $0xb0] sm:$0xff] }
 0x433   :  { %v770_v51 = vadd.f32 %v769_v49, %v667_v54 }
 0x435   :  { %1105 = vtanh.f32 %v770_v51 }
 0x43b   :  { %v1106_v57 = vpop.eup %1105 }
 0x43c   :  { %v773_v42 = vmul.f32 %v1106_v57, %v772_v59 }
 0x43e   :  { %v775_v39 = vadd.f32 %v774_v36, %v773_v42 }
 0x440   :  { %796 = vmatmul.f32.vlgmr.msra.gmra.mxu2 %v775_v39  ;;  %816 = vmatmul.f32.vlgmr.msra.gmra.mxu3 %v775_v39 }
 0x441   :  { %836 = vmatmul.f32.vlgmr.msrb.gmra.mxu0 %v775_v39 }
 0x4be   :  { %v837_v28 = vpop.f32.mrf.mxu0 }
 0x4bf   :  { %v880_v62 = vadd.f32 %v1175_v38, %v837_v28 }
 0x4c3   :  { %v797_v0 = vpop.f32.mrf.mxu2  ;;  %v817_v1 = vpop.f32.mrf.mxu3 }
 0x4c4   :  { %v840_v3 = vadd.f32 %v797_v0, %v777_v44  ;;  %v841_v4 = vadd.f32 %v817_v1, %v778_v58 }
 0x4c6   :  { %v1036_v6 = vmul.f32 -1.442695, %v840_v3  ;;  %v1037_v7 = vmul.f32 -1.442695, %v841_v4  ;;  %v891_v4 = vld [vmem:[#allocation3 + $0xb8] sm:$0xff] }
 0x4c8   :  { %1107 = vpow2.f32 %v1036_v6 }
 0x4c9   :  { %1109 = vpow2.f32 %v1037_v7 }
 0x4ce   :  { %v1108_v9 = vpop.eup %1107 }
 0x4cf   :  { %v1110_v10 = vpop.eup %1109  ;;  %v848_v12 = vadd.f32 1.0, %v1108_v9 }
 0x4d0   :  { %v849_v13 = vadd.f32 1.0, %v1110_v10 }
 0x4d1   :  { %1111 = vrcp.f32 %v848_v12  ;;  %v861_v22 = vand.u32 2147483648, %v848_v12  ;;  %v859_v27 = vand.u32 2147483647, %v848_v12  ;;  %vm855_vm1 = vweird.f32 %v848_v12 }
 0x4d2   :  { %1113 = vrcp.f32 %v849_v13  ;;  %v876_v11 = vand.u32 2147483648, %v849_v13  ;;  %vm870_vm5 = vweird.f32 %v849_v13  ;;  %v874_v17 = vand.u32 2147483647, %v849_v13 }
 0x4d3   :  { %v862_v52 = vor.u32 1.1754944e-38, %v861_v22  ;;  %vm860_vm3 = vcmp.eq.f32.partialorder %v859_v27, 8.507059e+37 }
 0x4d4   :  { %v877_v26 = vor.u32 1.1754944e-38, %v876_v11  ;;  %vm875_vm7 = vcmp.eq.f32.partialorder %v874_v17, 8.507059e+37 }
 0x4d7   :  { %v1112_v15 = vpop.eup %1111 }
 0x4d8   :  { %v1114_v16 = vpop.eup %1113  ;;  %v851_v18 = vmul.f32 %v1112_v15, %v848_v12  ;;  %vm856_vm0 = vweird.f32 %v1112_v15 }
 0x4d9   :  { %v866_v19 = vmul.f32 %v1114_v16, %v849_v13  ;;  %vm857_vm2 = vmor %vm855_vm1, %vm856_vm0  ;;  %vm871_vm4 = vweird.f32 %v1114_v16 }
 0x4da   :  { %v852_v21 = vsub.f32 1.0, %v851_v18  ;;  %vm872_vm6 = vmor %vm870_vm5, %vm871_vm4 }
 0x4db   :  { %v867_v24 = vsub.f32 1.0, %v866_v19 }
 0x4dc   :  { %v853_v25 = vmul.f32 %v1112_v15, %v852_v21 }
 0x4dd   :  { %v868_v60 = vmul.f32 %v1114_v16, %v867_v24 }
 0x4de   :  { %v854_v41 = vadd.f32 %v1112_v15, %v853_v25 }
 0x4df   :  { %v869_v8 = vadd.f32 %v1114_v16, %v868_v60 }
 0x4e0   :  { %v858_v63 = vsel %vm857_vm2, %v1112_v15, %v854_v41 }
 0x4e1   :  { %v863_v2 = vsel %vm860_vm3, %v862_v52, %v858_v63  ;;  %v873_v23 = vsel %vm872_vm6, %v1114_v16, %v869_v8 }
 0x4e2   :  { %v881_v14 = vmul.f32 %v880_v62, %v863_v2  ;;  %v878_v29 = vsel %vm875_vm7, %v877_v26, %v873_v23 }
 0x4e3   :  { %v884_v30 = vsub.f32 1.0, %v878_v29  ;;  %v886_v33 = vmul.f32 %v878_v29, %v775_v39 }
 0x4e4   :  { %v882_v20 = vadd.f32 %v881_v14, %v779_v5 }
 0x4e6   :  { %1115 = vtanh.f32 %v882_v20 }
 0x4ec   :  { %v1116_v31 = vpop.eup %1115 }
 0x4ed   :  { %v885_v32 = vmul.f32 %v1116_v31, %v884_v30 }
 0x4ef   :  { %v887_v34 = vadd.f32 %v886_v33, %v885_v32 }
 0x4f1   :  { %908 = vmatmul.f32.vlgmr.msrb.gmra.mxu1 %v887_v34  ;;  %928 = vmatmul.f32.vlgmr.msrb.gmra.mxu2 %v887_v34 }
 0x4f2   :  { %948 = vmatmul.f32.vlgmr.msrb.gmra.mxu3 %v887_v34 }
 0x56e   :  { %v909_v40 = vpop.f32.mrf.mxu1 }
 0x56f   :  { %v952_v43 = vadd.f32 %v909_v40, %v889_v37 }
 0x571   :  { %v1038_v45 = vmul.f32 -1.442695, %v952_v43 }
 0x573   :  { %1117 = vpow2.f32 %v1038_v45 }
 0x574   :  { %v929_v56 = vpop.f32.mrf.mxu2 }
 0x575   :  { %v953_v35 = vadd.f32 %v929_v56, %v890_v46  ;;  %v949_v36 = vpop.f32.mrf.mxu3 }
 0x576   :  { %v992_v3 = vadd.f32 %v1175_v38, %v949_v36 }
 0x577   :  { %v1039_v54 = vmul.f32 -1.442695, %v953_v35 }
 0x579   :  { %v1118_v55 = vpop.eup %1117  ;;  %1119 = vpow2.f32 %v1039_v54 }
 0x57a   :  { %v960_v48 = vadd.f32 1.0, %v1118_v55 }
 0x57c   :  { %1121 = vrcp.f32 %v960_v48  ;;  %v973_v53 = vand.u32 2147483648, %v960_v48  ;;  %v971_v57 = vand.u32 2147483647, %v960_v48  ;;  %vm967_vm9 = vweird.f32 %v960_v48 }
 0x57e   :  { %v974_v58 = vor.u32 1.1754944e-38, %v973_v53  ;;  %vm972_vm11 = vcmp.eq.f32.partialorder %v971_v57, 8.507059e+37 }
 0x57f   :  { %v1120_v49 = vpop.eup %1119 }
 0x580   :  { %v961_v50 = vadd.f32 1.0, %v1120_v49 }
 0x582   :  { %v1122_v51 = vpop.eup %1121  ;;  %1123 = vrcp.f32 %v961_v50  ;;  %v988_v10 = vand.u32 2147483648, %v961_v50  ;;  %v986_v12 = vand.u32 2147483647, %v961_v50  ;;  %vm982_vm13 = vweird.f32 %v961_v50 }
 0x583   :  { %v963_v61 = vmul.f32 %v1122_v51, %v960_v48  ;;  %vm968_vm8 = vweird.f32 %v1122_v51 }
 0x584   :  { %vm969_vm10 = vmor %vm967_vm9, %vm968_vm8  ;;  %v989_v18 = vor.u32 1.1754944e-38, %v988_v10  ;;  %vm987_vm15 = vcmp.eq.f32.partialorder %v986_v12, 8.507059e+37 }
 0x585   :  { %v964_v47 = vsub.f32 1.0, %v963_v61 }
 0x587   :  { %v965_v59 = vmul.f32 %v1122_v51, %v964_v47 }
 0x588   :  { %v1124_v42 = vpop.eup %1123 }
 0x589   :  { %v978_v39 = vmul.f32 %v1124_v42, %v961_v50  ;;  %v966_v44 = vadd.f32 %v1122_v51, %v965_v59  ;;  %vm983_vm12 = vweird.f32 %v1124_v42 }
 0x58a   :  { %vm984_vm14 = vmor %vm982_vm13, %vm983_vm12 }
 0x58b   :  { %v979_v0 = vsub.f32 1.0, %v978_v39  ;;  %v970_v1 = vsel %vm969_vm10, %v1122_v51, %v966_v44 }
 0x58c   :  { %v975_v6 = vsel %vm972_vm11, %v974_v58, %v970_v1 }
 0x58d   :  { %v993_v7 = vmul.f32 %v992_v3, %v975_v6  ;;  %v980_v9 = vmul.f32 %v1124_v42, %v979_v0 }
 0x58f   :  { %v994_v13 = vadd.f32 %v993_v7, %v891_v4  ;;  %v981_v15 = vadd.f32 %v1124_v42, %v980_v9 }
 0x591   :  { %1125 = vtanh.f32 %v994_v13  ;;  %v985_v16 = vsel %vm984_vm14, %v1124_v42, %v981_v15 }
 0x592   :  { %v990_v19 = vsel %vm987_vm15, %v989_v18, %v985_v16 }
 0x593   :  { %v996_v21 = vsub.f32 1.0, %v990_v19  ;;  %v998_v25 = vmul.f32 %v990_v19, %v887_v34 }
 0x597   :  { %v1126_v22 = vpop.eup %1125 }
 0x598   :  { %v997_v24 = vmul.f32 %v1126_v22, %v996_v21 }
 0x59a   :  { %v999_v27 = vadd.f32 %v998_v25, %v997_v24 }
 0x59c   :  { %1005 = vst [vmem:[#allocation8] sm:$0xff] %v999_v27 }
 0x59d   :  { %1016 = dma.vmem_to_hbm [thread:$0]  %s1012_s26, 128, %s1014_s29, [#allocation5]  }
 0x59e   :  { %1252 = dma.done.wait [#allocation5], 128  }
 0x59f   :  { %1253 = vsyncadd [#allocation5], 4294967168 }
 0x5a0   :  { %1021 = vsyncpa [#allocation4], 1 }
 0x5a1   :  { %1022 = vsyncpa [#allocation7], 1 }
 0x5a2   :  { %1023 = vsyncpa [#allocation5], 1 }

</bundles_post_ra>
